<compile_context>
chip_gen: v6e
topology: v6e:2x2x1
jax: 0.10.0
libtpu: 0.0.40
codegen_flags: <defaults>
</compile_context>

<pallas_src>
import functools

import jax
import jax.numpy as jnp
import numpy as np
from jax.experimental import pallas as pl
from jax.experimental.pallas import tpu as pltpu

K = 5            # conv kernel size (5x5)
H0 = 32          # input lines per image
H1 = 16          # lines per image after pool1 (valid 14)
H2 = 8           # lines per image after pool2 (valid 5)
LANES = 128
ROW_PAD = 8      # zero lines appended so row-shifted reads stay in bounds

_VMEM = pl.BlockSpec(memory_space=pltpu.MemorySpace.VMEM)


# ------------------------------ fused kernel -------------------------------

def _lenet_kernel(x_ref, w1_ref, b1_ref, w2_ref, b2_ref,
                  wl1_ref, bl1_ref, wl2_ref, bl2_ref, wl3_ref, bl3_ref,
                  out_ref,
                  yw1_ref, a1_ref, yw2_ref, a2_ref, *, batch):
    B = batch
    N0 = B * H0          # conv1 output line-rows (full 32-line grid per image)
    N1 = B * H1          # pool1 / conv2 line-rows (16 per image)
    N2 = B * H2          # pool2 line-rows (8 per image)

    # ---- conv1 + bias + ReLU: 5 row-shifted bf16 matmuls, f32 register acc --
    acc = jnp.dot(x_ref[pl.ds(0, N0), :].astype(jnp.bfloat16), w1_ref[0],
                  preferred_element_type=jnp.float32)
    for kh in range(1, K):
        acc += jnp.dot(x_ref[pl.ds(kh, N0), :].astype(jnp.bfloat16),
                       w1_ref[kh], preferred_element_type=jnp.float32)
    y1 = jnp.maximum(acc + b1_ref[...], 0.0)               # (N0, 256) f32

    # ---- 2x2 max-pool #1: width = max of even/odd lane halves,
    #      height = max of stride-2 line-row pairs ---------------------------
    yw1_ref[...] = jnp.maximum(y1[:, :LANES], y1[:, LANES:])
    a1 = jnp.maximum(yw1_ref[pl.ds(0, N1, stride=2), :],
                     yw1_ref[pl.ds(1, N1, stride=2), :])   # (N1, 128) f32
    a1_ref[pl.ds(0, N1), :] = a1
    a1_ref[pl.ds(N1, ROW_PAD), :] = jnp.zeros((ROW_PAD, LANES), jnp.float32)

    # ---- conv2 + bias + ReLU ------------------------------------------------
    acc2 = jnp.dot(a1_ref[pl.ds(0, N1), :].astype(jnp.bfloat16), w2_ref[0],
                   preferred_element_type=jnp.float32)
    for kh in range(1, K):
        acc2 += jnp.dot(a1_ref[pl.ds(kh, N1), :].astype(jnp.bfloat16),
                        w2_ref[kh], preferred_element_type=jnp.float32)
    y2 = jnp.maximum(acc2 + b2_ref[...], 0.0)              # (N1, 256) f32

    # ---- 2x2 max-pool #2 ----------------------------------------------------
    yw2_ref[...] = jnp.maximum(y2[:, :LANES], y2[:, LANES:])
    a2_ref[...] = jnp.maximum(yw2_ref[pl.ds(0, N2, stride=2), :],
                              yw2_ref[pl.ds(1, N2, stride=2), :])

    # ---- lin1 + ReLU: 5 full-lane matmuls over the 5 valid pooled rows ------
    # torch's NCHW flatten order is folded into wl1's row permutation at init.
    h1 = jnp.dot(a2_ref[pl.ds(0, B, stride=H2), :].astype(jnp.bfloat16),
                 wl1_ref[pl.ds(0, LANES), :], preferred_element_type=jnp.float32)
    for h in range(1, K):
        h1 += jnp.dot(a2_ref[pl.ds(h, B, stride=H2), :].astype(jnp.bfloat16),
                      wl1_ref[pl.ds(h * LANES, LANES), :],
                      preferred_element_type=jnp.float32)
    h1 = jnp.maximum(h1 + bl1_ref[...], 0.0)               # (B, 256) f32

    # ---- lin2 + ReLU, lin3 (100 valid logits of 128 lanes; sliced outside) --
    h2 = jnp.maximum(
        jnp.dot(h1.astype(jnp.bfloat16), wl2_ref[...],
                preferred_element_type=jnp.float32) + bl2_ref[...], 0.0)
    out_ref[...] = (jnp.dot(h2.astype(jnp.bfloat16), wl3_ref[...],
                            preferred_element_type=jnp.float32)
                    + bl3_ref[...])


def _build_call(batch):
    B = batch
    N0, N1, N2 = B * H0, B * H1, B * H2
    flops = 2 * (K * N0 * LANES * 256 + K * N1 * LANES * 256
                 + B * (K * LANES) * 256 + B * 256 * LANES + B * LANES * LANES)
    bytes_accessed = (
        4 * (N0 + ROW_PAD) * LANES                          # x lines (f32)
        + 2 * (2 * K * LANES * 256                          # bf16 conv weights
               + K * LANES * 256 + 256 * LANES + LANES * LANES)  # bf16 lin w
        + 4 * (3 * 256 + 2 * LANES)                         # f32 biases
        + 4 * B * LANES)                                    # logits out
    return pl.pallas_call(
        functools.partial(_lenet_kernel, batch=B),
        out_shape=jax.ShapeDtypeStruct((B, LANES), jnp.float32),
        in_specs=[_VMEM] * 11,
        out_specs=_VMEM,
        scratch_shapes=[
            pltpu.VMEM((N0, LANES), jnp.float32),            # width-pooled conv1
            pltpu.VMEM((N1 + ROW_PAD, LANES), jnp.float32),  # a1 lines (+0 pad)
            pltpu.VMEM((N1, LANES), jnp.float32),            # width-pooled conv2
            pltpu.VMEM((N2, LANES), jnp.float32),            # a2 lines
        ],
        # ~1.3 MiB actually resident; 8 MiB leaves headroom without claiming
        # the whole scoped-VMEM budget.
        compiler_params=pltpu.CompilerParams(
            vmem_limit_bytes=8 * 1024 * 1024),
        cost_estimate=pl.CostEstimate(flops=flops, transcendentals=0,
                                      bytes_accessed=bytes_accessed),
    )


# --------------------------- parameters & prep -----------------------------

def init_params(key):
    ks = jax.random.split(key, 10)

    def rand(k, shape, fan_in):
        return (jax.random.normal(k, shape, jnp.float32)
                / jnp.sqrt(jnp.float32(fan_in))).astype(jnp.float32)

    return {
        "cnn1_w": rand(ks[0], (6, 3, 5, 5), 3 * 5 * 5),
        "cnn1_b": rand(ks[1], (6,), 3 * 5 * 5),
        "cnn2_w": rand(ks[2], (16, 6, 5, 5), 6 * 5 * 5),
        "cnn2_b": rand(ks[3], (16,), 6 * 5 * 5),
        "lin1_w": rand(ks[4], (256, 400), 400),   # torch Linear: (out, in)
        "lin1_b": rand(ks[5], (256,), 400),
        "lin2_w": rand(ks[6], (128, 256), 256),
        "lin2_b": rand(ks[7], (128,), 256),
        "lin3_w": rand(ks[8], (100, 128), 128),
        "lin3_b": rand(ks[9], (100,), 128),
    }


def prepare_params(params):
    """One-time re-layout into width-Toeplitz / lane-packed bf16 matrices."""
    w1 = np.asarray(params["cnn1_w"], np.float32)   # (6, 3, 5, 5)  OIHW
    b1 = np.asarray(params["cnn1_b"], np.float32)
    w2 = np.asarray(params["cnn2_w"], np.float32)   # (16, 6, 5, 5)
    b2 = np.asarray(params["cnn2_b"], np.float32)
    l1 = np.asarray(params["lin1_w"], np.float32)   # (256, 400)
    l2 = np.asarray(params["lin2_w"], np.float32)   # (128, 256)
    l3 = np.asarray(params["lin3_w"], np.float32)   # (100, 128)

    # conv1: contraction lane = w_in*3 + c (96 of 128 live);
    # output lane = (w_out//2)*6 + co + (w_out%2)*128  (even/odd pool split).
    W1 = np.zeros((K, LANES, 256), np.float32)
    B1 = np.zeros((1, 256), np.float32)
    for w_out in range(28):
        col = (w_out // 2) * 6 + (w_out % 2) * LANES
        B1[0, col:col + 6] = b1
        for kh in range(K):
            for kw in range(K):
                w_in = w_out + kw
                W1[kh, w_in * 3:w_in * 3 + 3, col:col + 6] = w1[:, :, kh, kw].T

    # conv2: contraction lane = w_in*6 + c (84 of 128 live);
    # output lane = (w_out//2)*16 + co + (w_out%2)*128.
    W2 = np.zeros((K, LANES, 256), np.float32)
    B2 = np.zeros((1, 256), np.float32)
    for w_out in range(10):
        col = (w_out // 2) * 16 + (w_out % 2) * LANES
        B2[0, col:col + 16] = b2
        for kh in range(K):
            for kw in range(K):
                w_in = w_out + kw
                W2[kh, w_in * 6:w_in * 6 + 6, col:col + 16] = w2[:, :, kh, kw].T

    # lin1: LHS lane for row-band h is w*16 + c; torch flatten idx = c*25+h*5+w.
    WL1 = np.zeros((K * LANES, 256), np.float32)
    for h in range(5):
        for w in range(5):
            for c in range(16):
                WL1[h * LANES + w * 16 + c, :] = l1[:, c * 25 + h * 5 + w]
    BL1 = np.asarray(params["lin1_b"], np.float32)[None, :]

    WL2 = l2.T                                      # (256, 128)
    BL2 = np.asarray(params["lin2_b"], np.float32)[None, :]
    WL3 = np.zeros((LANES, LANES), np.float32)
    WL3[:, :100] = l3.T                             # (128, 100) -> (128, 128)
    BL3 = np.zeros((1, LANES), np.float32)
    BL3[0, :100] = np.asarray(params["lin3_b"], np.float32)

    bf = lambda a: jnp.asarray(a, jnp.bfloat16)     # matmul operands
    f32 = lambda a: jnp.asarray(a, jnp.float32)     # biases (f32 VPU path)
    return (bf(W1), f32(B1), bf(W2), f32(B2),
            bf(WL1), f32(BL1), bf(WL2), f32(BL2), bf(WL3), f32(BL3))


# --------------------------------- forward ---------------------------------

@jax.jit
def _forward_impl(prepped, x_nchw):
    B, C, H, W = x_nchw.shape
    assert (C, H, W) == (3, H0, H0)
    # NCHW -> per-(b,h) "lines": row = b*32 + h, lane = w*3 + c (96 of 128),
    # plus ROW_PAD zero lines so row-shifted reads in the kernel stay in bounds.
    x = jnp.transpose(x_nchw, (0, 2, 3, 1)).reshape(B * H0, H0 * 3)
    x = jnp.pad(x, ((0, ROW_PAD), (0, LANES - H0 * 3)))
    out = _build_call(B)(x, *prepped)
    return out[:, :100]                             # drop zero-padded classes


def lenet_forward(prepped, x_nchw):
    logits = _forward_impl(prepped, x_nchw)
    B = int(x_nchw.shape[0])
    shape_dict = {1: [B, 6, 14, 14], 2: [B, 16, 5, 5], 3: [B, 400],
                  4: [B, 256], 5: [B, 128], 6: [B, 100]}
    return logits, shape_dict


# ------------------------- pure-JAX reference check ------------------------

def lenet_reference(params, x):
    hp = jax.lax.Precision.HIGHEST
    dn = ("NCHW", "OIHW", "NCHW")
    y = jax.lax.conv_general_dilated(x, params["cnn1_w"], (1, 1), "VALID",
                                     dimension_numbers=dn, precision=hp)
    y = jnp.maximum(y + params["cnn1_b"][None, :, None, None], 0.0)
    y = jax.lax.reduce_window(y, -jnp.inf, jax.lax.max,
                              (1, 1, 2, 2), (1, 1, 2, 2), "VALID")
    y = jax.lax.conv_general_dilated(y, params["cnn2_w"], (1, 1), "VALID",
                                     dimension_numbers=dn, precision=hp)
    y = jnp.maximum(y + params["cnn2_b"][None, :, None, None], 0.0)
    y = jax.lax.reduce_window(y, -jnp.inf, jax.lax.max,
                              (1, 1, 2, 2), (1, 1, 2, 2), "VALID")
    y = y.reshape(y.shape[0], -1)
    y = jnp.maximum(jnp.dot(y, params["lin1_w"].T, precision=hp)
                    + params["lin1_b"], 0.0)
    y = jnp.maximum(jnp.dot(y, params["lin2_w"].T, precision=hp)
                    + params["lin2_b"], 0.0)
    return jnp.dot(y, params["lin3_w"].T, precision=hp) + params["lin3_b"]


if __name__ == "__main__":
    key = jax.random.PRNGKey(0)
    pkey, xkey = jax.random.split(key)
    params = init_params(pkey)
    prepped = prepare_params(params)          # one-time weight re-layout
    x = jax.random.normal(xkey, (2, 3, 32, 32), jnp.float32)   # batch=2

    out, shape_dict = lenet_forward(prepped, x)
    out = jax.block_until_ready(out)

    assert out.shape == (2, 100) and out.dtype == jnp.float32
    assert shape_dict == {1: [2, 6, 14, 14], 2: [2, 16, 5, 5],
                          3: [2, 400], 4: [2, 256], 5: [2, 128], 6: [2, 100]}

    ref = lenet_reference(params, x)
    # bf16 matmul operands with f32 accumulation -> ~1e-2 worst-case logit err.
    assert jnp.allclose(out, ref, atol=5e-2, rtol=5e-2), \
        float(jnp.max(jnp.abs(out - ref)))
    print("KERNEL_OK")
</pallas_src>

<mosaic_0001>
module attributes {stable_mosaic.version = 11 : i64} {
  func.func @_lenet_kernel(%arg0: memref<72x128xf32, #tpu.memory_space<vmem>>, %arg1: memref<5x128x256xbf16, #tpu.memory_space<vmem>>, %arg2: memref<1x256xf32, #tpu.memory_space<vmem>>, %arg3: memref<5x128x256xbf16, #tpu.memory_space<vmem>>, %arg4: memref<1x256xf32, #tpu.memory_space<vmem>>, %arg5: memref<640x256xbf16, #tpu.memory_space<vmem>>, %arg6: memref<1x256xf32, #tpu.memory_space<vmem>>, %arg7: memref<256x128xbf16, #tpu.memory_space<vmem>>, %arg8: memref<1x128xf32, #tpu.memory_space<vmem>>, %arg9: memref<128x128xbf16, #tpu.memory_space<vmem>>, %arg10: memref<1x128xf32, #tpu.memory_space<vmem>>, %arg11: memref<2x128xf32, #tpu.memory_space<vmem>>, %arg12: memref<64x128xf32, #tpu.memory_space<vmem>>, %arg13: memref<40x128xf32, #tpu.memory_space<vmem>>, %arg14: memref<32x128xf32, #tpu.memory_space<vmem>>, %arg15: memref<16x128xf32, #tpu.memory_space<vmem>>) attributes {dimension_semantics = [], scalar_prefetch = 0 : i64, scratch_operands = 4 : i64, tpu.core_type = #tpu.core_type<tc>} {
    %c0 = arith.constant 0 : index
    %c0_0 = arith.constant 0 : index
    %0 = vector.load %arg0[%c0, %c0_0] : memref<72x128xf32, #tpu.memory_space<vmem>>, vector<64x128xf32>
    %1 = arith.truncf %0 : vector<64x128xf32> to vector<64x128xbf16>
    %c0_1 = arith.constant 0 : index
    %c0_2 = arith.constant 0 : index
    %c0_3 = arith.constant 0 : index
    %2 = vector.load %arg1[%c0_1, %c0_2, %c0_3] : memref<5x128x256xbf16, #tpu.memory_space<vmem>>, vector<1x128x256xbf16>
    %3 = vector.shape_cast %2 : vector<1x128x256xbf16> to vector<128x256xbf16>
    %cst = arith.constant dense<0.000000e+00> : vector<64x256xf32>
    %4 = tpu.matmul %1, %3, %cst {dimension_numbers = #tpu.dot_dimension_numbers<[1], [0], [0], [1], [0, 0, 1, 1], [], []>} : vector<64x128xbf16>, vector<128x256xbf16>, vector<64x256xf32> -> vector<64x256xf32>
    %c1 = arith.constant 1 : index
    %c0_4 = arith.constant 0 : index
    %5 = vector.load %arg0[%c1, %c0_4] : memref<72x128xf32, #tpu.memory_space<vmem>>, vector<64x128xf32>
    %6 = arith.truncf %5 : vector<64x128xf32> to vector<64x128xbf16>
    %c1_5 = arith.constant 1 : index
    %c0_6 = arith.constant 0 : index
    %c0_7 = arith.constant 0 : index
    %7 = vector.load %arg1[%c1_5, %c0_6, %c0_7] : memref<5x128x256xbf16, #tpu.memory_space<vmem>>, vector<1x128x256xbf16>
    %8 = vector.shape_cast %7 : vector<1x128x256xbf16> to vector<128x256xbf16>
    %cst_8 = arith.constant dense<0.000000e+00> : vector<64x256xf32>
    %9 = tpu.matmul %6, %8, %cst_8 {dimension_numbers = #tpu.dot_dimension_numbers<[1], [0], [0], [1], [0, 0, 1, 1], [], []>} : vector<64x128xbf16>, vector<128x256xbf16>, vector<64x256xf32> -> vector<64x256xf32>
    %10 = arith.addf %4, %9 : vector<64x256xf32>
    %c2 = arith.constant 2 : index
    %c0_9 = arith.constant 0 : index
    %11 = vector.load %arg0[%c2, %c0_9] : memref<72x128xf32, #tpu.memory_space<vmem>>, vector<64x128xf32>
    %12 = arith.truncf %11 : vector<64x128xf32> to vector<64x128xbf16>
    %c2_10 = arith.constant 2 : index
    %c0_11 = arith.constant 0 : index
    %c0_12 = arith.constant 0 : index
    %13 = vector.load %arg1[%c2_10, %c0_11, %c0_12] : memref<5x128x256xbf16, #tpu.memory_space<vmem>>, vector<1x128x256xbf16>
    %14 = vector.shape_cast %13 : vector<1x128x256xbf16> to vector<128x256xbf16>
    %cst_13 = arith.constant dense<0.000000e+00> : vector<64x256xf32>
    %15 = tpu.matmul %12, %14, %cst_13 {dimension_numbers = #tpu.dot_dimension_numbers<[1], [0], [0], [1], [0, 0, 1, 1], [], []>} : vector<64x128xbf16>, vector<128x256xbf16>, vector<64x256xf32> -> vector<64x256xf32>
    %16 = arith.addf %10, %15 : vector<64x256xf32>
    %c3 = arith.constant 3 : index
    %c0_14 = arith.constant 0 : index
    %17 = vector.load %arg0[%c3, %c0_14] : memref<72x128xf32, #tpu.memory_space<vmem>>, vector<64x128xf32>
    %18 = arith.truncf %17 : vector<64x128xf32> to vector<64x128xbf16>
    %c3_15 = arith.constant 3 : index
    %c0_16 = arith.constant 0 : index
    %c0_17 = arith.constant 0 : index
    %19 = vector.load %arg1[%c3_15, %c0_16, %c0_17] : memref<5x128x256xbf16, #tpu.memory_space<vmem>>, vector<1x128x256xbf16>
    %20 = vector.shape_cast %19 : vector<1x128x256xbf16> to vector<128x256xbf16>
    %cst_18 = arith.constant dense<0.000000e+00> : vector<64x256xf32>
    %21 = tpu.matmul %18, %20, %cst_18 {dimension_numbers = #tpu.dot_dimension_numbers<[1], [0], [0], [1], [0, 0, 1, 1], [], []>} : vector<64x128xbf16>, vector<128x256xbf16>, vector<64x256xf32> -> vector<64x256xf32>
    %22 = arith.addf %16, %21 : vector<64x256xf32>
    %c4 = arith.constant 4 : index
    %c0_19 = arith.constant 0 : index
    %23 = vector.load %arg0[%c4, %c0_19] : memref<72x128xf32, #tpu.memory_space<vmem>>, vector<64x128xf32>
    %24 = arith.truncf %23 : vector<64x128xf32> to vector<64x128xbf16>
    %c4_20 = arith.constant 4 : index
    %c0_21 = arith.constant 0 : index
    %c0_22 = arith.constant 0 : index
    %25 = vector.load %arg1[%c4_20, %c0_21, %c0_22] : memref<5x128x256xbf16, #tpu.memory_space<vmem>>, vector<1x128x256xbf16>
    %26 = vector.shape_cast %25 : vector<1x128x256xbf16> to vector<128x256xbf16>
    %cst_23 = arith.constant dense<0.000000e+00> : vector<64x256xf32>
    %27 = tpu.matmul %24, %26, %cst_23 {dimension_numbers = #tpu.dot_dimension_numbers<[1], [0], [0], [1], [0, 0, 1, 1], [], []>} : vector<64x128xbf16>, vector<128x256xbf16>, vector<64x256xf32> -> vector<64x256xf32>
    %28 = arith.addf %22, %27 : vector<64x256xf32>
    %c0_24 = arith.constant 0 : index
    %c0_25 = arith.constant 0 : index
    %29 = vector.load %arg2[%c0_24, %c0_25] : memref<1x256xf32, #tpu.memory_space<vmem>>, vector<1x256xf32>
    %30 = vector.broadcast %29 : vector<1x256xf32> to vector<64x256xf32>
    %31 = arith.addf %28, %30 : vector<64x256xf32>
    %cst_26 = arith.constant 0.000000e+00 : f32
    %32 = vector.broadcast %cst_26 : f32 to vector<64x256xf32>
    %33 = arith.maximumf %31, %32 : vector<64x256xf32>
    %34 = vector.extract_strided_slice %33 {offsets = [0, 0], sizes = [64, 128], strides = [1, 1]} : vector<64x256xf32> to vector<64x128xf32>
    %35 = vector.extract_strided_slice %33 {offsets = [0, 128], sizes = [64, 128], strides = [1, 1]} : vector<64x256xf32> to vector<64x128xf32>
    %36 = arith.maximumf %34, %35 : vector<64x128xf32>
    %c0_27 = arith.constant 0 : index
    %c0_28 = arith.constant 0 : index
    %37 = vector.load %arg12[%c0_27, %c0_28] : memref<64x128xf32, #tpu.memory_space<vmem>>, vector<64x128xf32>
    tpu.vector_store %arg12[%c0_27, %c0_28], %36 {strides = array<i32>} : memref<64x128xf32, #tpu.memory_space<vmem>>, vector<64x128xf32>,
    %c0_29 = arith.constant 0 : index
    %c0_30 = arith.constant 0 : index
    %38 = tpu.strided_load %arg12[%c0_29, %c0_30] {strides = array<i32: 2, 1>} : memref<64x128xf32, #tpu.memory_space<vmem>>, vector<32x128xf32>
    %c1_31 = arith.constant 1 : index
    %c0_32 = arith.constant 0 : index
    %39 = tpu.strided_load %arg12[%c1_31, %c0_32] {strides = array<i32: 2, 1>} : memref<64x128xf32, #tpu.memory_space<vmem>>, vector<32x128xf32>
    %40 = arith.maximumf %38, %39 : vector<32x128xf32>
    %c0_33 = arith.constant 0 : index
    %c0_34 = arith.constant 0 : index
    %41 = vector.load %arg13[%c0_33, %c0_34] : memref<40x128xf32, #tpu.memory_space<vmem>>, vector<32x128xf32>
    tpu.vector_store %arg13[%c0_33, %c0_34], %40 {strides = array<i32>} : memref<40x128xf32, #tpu.memory_space<vmem>>, vector<32x128xf32>,
    %cst_35 = arith.constant 0.000000e+00 : f32
    %42 = vector.broadcast %cst_35 : f32 to vector<8x128xf32>
    %c32 = arith.constant 32 : index
    %c0_36 = arith.constant 0 : index
    %43 = vector.load %arg13[%c32, %c0_36] : memref<40x128xf32, #tpu.memory_space<vmem>>, vector<8x128xf32>
    tpu.vector_store %arg13[%c32, %c0_36], %42 {strides = array<i32>} : memref<40x128xf32, #tpu.memory_space<vmem>>, vector<8x128xf32>,
    %c0_37 = arith.constant 0 : index
    %c0_38 = arith.constant 0 : index
    %44 = vector.load %arg13[%c0_37, %c0_38] : memref<40x128xf32, #tpu.memory_space<vmem>>, vector<32x128xf32>
    %45 = arith.truncf %44 : vector<32x128xf32> to vector<32x128xbf16>
    %c0_39 = arith.constant 0 : index
    %c0_40 = arith.constant 0 : index
    %c0_41 = arith.constant 0 : index
    %46 = vector.load %arg3[%c0_39, %c0_40, %c0_41] : memref<5x128x256xbf16, #tpu.memory_space<vmem>>, vector<1x128x256xbf16>
    %47 = vector.shape_cast %46 : vector<1x128x256xbf16> to vector<128x256xbf16>
    %cst_42 = arith.constant dense<0.000000e+00> : vector<32x256xf32>
    %48 = tpu.matmul %45, %47, %cst_42 {dimension_numbers = #tpu.dot_dimension_numbers<[1], [0], [0], [1], [0, 0, 1, 1], [], []>} : vector<32x128xbf16>, vector<128x256xbf16>, vector<32x256xf32> -> vector<32x256xf32>
    %c1_43 = arith.constant 1 : index
    %c0_44 = arith.constant 0 : index
    %49 = vector.load %arg13[%c1_43, %c0_44] : memref<40x128xf32, #tpu.memory_space<vmem>>, vector<32x128xf32>
    %50 = arith.truncf %49 : vector<32x128xf32> to vector<32x128xbf16>
    %c1_45 = arith.constant 1 : index
    %c0_46 = arith.constant 0 : index
    %c0_47 = arith.constant 0 : index
    %51 = vector.load %arg3[%c1_45, %c0_46, %c0_47] : memref<5x128x256xbf16, #tpu.memory_space<vmem>>, vector<1x128x256xbf16>
    %52 = vector.shape_cast %51 : vector<1x128x256xbf16> to vector<128x256xbf16>
    %cst_48 = arith.constant dense<0.000000e+00> : vector<32x256xf32>
    %53 = tpu.matmul %50, %52, %cst_48 {dimension_numbers = #tpu.dot_dimension_numbers<[1], [0], [0], [1], [0, 0, 1, 1], [], []>} : vector<32x128xbf16>, vector<128x256xbf16>, vector<32x256xf32> -> vector<32x256xf32>
    %54 = arith.addf %48, %53 : vector<32x256xf32>
    %c2_49 = arith.constant 2 : index
    %c0_50 = arith.constant 0 : index
    %55 = vector.load %arg13[%c2_49, %c0_50] : memref<40x128xf32, #tpu.memory_space<vmem>>, vector<32x128xf32>
    %56 = arith.truncf %55 : vector<32x128xf32> to vector<32x128xbf16>
    %c2_51 = arith.constant 2 : index
    %c0_52 = arith.constant 0 : index
    %c0_53 = arith.constant 0 : index
    %57 = vector.load %arg3[%c2_51, %c0_52, %c0_53] : memref<5x128x256xbf16, #tpu.memory_space<vmem>>, vector<1x128x256xbf16>
    %58 = vector.shape_cast %57 : vector<1x128x256xbf16> to vector<128x256xbf16>
    %cst_54 = arith.constant dense<0.000000e+00> : vector<32x256xf32>
    %59 = tpu.matmul %56, %58, %cst_54 {dimension_numbers = #tpu.dot_dimension_numbers<[1], [0], [0], [1], [0, 0, 1, 1], [], []>} : vector<32x128xbf16>, vector<128x256xbf16>, vector<32x256xf32> -> vector<32x256xf32>
    %60 = arith.addf %54, %59 : vector<32x256xf32>
    %c3_55 = arith.constant 3 : index
    %c0_56 = arith.constant 0 : index
    %61 = vector.load %arg13[%c3_55, %c0_56] : memref<40x128xf32, #tpu.memory_space<vmem>>, vector<32x128xf32>
    %62 = arith.truncf %61 : vector<32x128xf32> to vector<32x128xbf16>
    %c3_57 = arith.constant 3 : index
    %c0_58 = arith.constant 0 : index
    %c0_59 = arith.constant 0 : index
    %63 = vector.load %arg3[%c3_57, %c0_58, %c0_59] : memref<5x128x256xbf16, #tpu.memory_space<vmem>>, vector<1x128x256xbf16>
    %64 = vector.shape_cast %63 : vector<1x128x256xbf16> to vector<128x256xbf16>
    %cst_60 = arith.constant dense<0.000000e+00> : vector<32x256xf32>
    %65 = tpu.matmul %62, %64, %cst_60 {dimension_numbers = #tpu.dot_dimension_numbers<[1], [0], [0], [1], [0, 0, 1, 1], [], []>} : vector<32x128xbf16>, vector<128x256xbf16>, vector<32x256xf32> -> vector<32x256xf32>
    %66 = arith.addf %60, %65 : vector<32x256xf32>
    %c4_61 = arith.constant 4 : index
    %c0_62 = arith.constant 0 : index
    %67 = vector.load %arg13[%c4_61, %c0_62] : memref<40x128xf32, #tpu.memory_space<vmem>>, vector<32x128xf32>
    %68 = arith.truncf %67 : vector<32x128xf32> to vector<32x128xbf16>
    %c4_63 = arith.constant 4 : index
    %c0_64 = arith.constant 0 : index
    %c0_65 = arith.constant 0 : index
    %69 = vector.load %arg3[%c4_63, %c0_64, %c0_65] : memref<5x128x256xbf16, #tpu.memory_space<vmem>>, vector<1x128x256xbf16>
    %70 = vector.shape_cast %69 : vector<1x128x256xbf16> to vector<128x256xbf16>
    %cst_66 = arith.constant dense<0.000000e+00> : vector<32x256xf32>
    %71 = tpu.matmul %68, %70, %cst_66 {dimension_numbers = #tpu.dot_dimension_numbers<[1], [0], [0], [1], [0, 0, 1, 1], [], []>} : vector<32x128xbf16>, vector<128x256xbf16>, vector<32x256xf32> -> vector<32x256xf32>
    %72 = arith.addf %66, %71 : vector<32x256xf32>
    %c0_67 = arith.constant 0 : index
    %c0_68 = arith.constant 0 : index
    %73 = vector.load %arg4[%c0_67, %c0_68] : memref<1x256xf32, #tpu.memory_space<vmem>>, vector<1x256xf32>
    %74 = vector.broadcast %73 : vector<1x256xf32> to vector<32x256xf32>
    %75 = arith.addf %72, %74 : vector<32x256xf32>
    %cst_69 = arith.constant 0.000000e+00 : f32
    %76 = vector.broadcast %cst_69 : f32 to vector<32x256xf32>
    %77 = arith.maximumf %75, %76 : vector<32x256xf32>
    %78 = vector.extract_strided_slice %77 {offsets = [0, 0], sizes = [32, 128], strides = [1, 1]} : vector<32x256xf32> to vector<32x128xf32>
    %79 = vector.extract_strided_slice %77 {offsets = [0, 128], sizes = [32, 128], strides = [1, 1]} : vector<32x256xf32> to vector<32x128xf32>
    %80 = arith.maximumf %78, %79 : vector<32x128xf32>
    %c0_70 = arith.constant 0 : index
    %c0_71 = arith.constant 0 : index
    %81 = vector.load %arg14[%c0_70, %c0_71] : memref<32x128xf32, #tpu.memory_space<vmem>>, vector<32x128xf32>
    tpu.vector_store %arg14[%c0_70, %c0_71], %80 {strides = array<i32>} : memref<32x128xf32, #tpu.memory_space<vmem>>, vector<32x128xf32>,
    %c0_72 = arith.constant 0 : index
    %c0_73 = arith.constant 0 : index
    %82 = tpu.strided_load %arg14[%c0_72, %c0_73] {strides = array<i32: 2, 1>} : memref<32x128xf32, #tpu.memory_space<vmem>>, vector<16x128xf32>
    %c1_74 = arith.constant 1 : index
    %c0_75 = arith.constant 0 : index
    %83 = tpu.strided_load %arg14[%c1_74, %c0_75] {strides = array<i32: 2, 1>} : memref<32x128xf32, #tpu.memory_space<vmem>>, vector<16x128xf32>
    %84 = arith.maximumf %82, %83 : vector<16x128xf32>
    %c0_76 = arith.constant 0 : index
    %c0_77 = arith.constant 0 : index
    %85 = vector.load %arg15[%c0_76, %c0_77] : memref<16x128xf32, #tpu.memory_space<vmem>>, vector<16x128xf32>
    tpu.vector_store %arg15[%c0_76, %c0_77], %84 {strides = array<i32>} : memref<16x128xf32, #tpu.memory_space<vmem>>, vector<16x128xf32>,
    %c0_78 = arith.constant 0 : index
    %c0_79 = arith.constant 0 : index
    %86 = tpu.strided_load %arg15[%c0_78, %c0_79] {strides = array<i32: 8, 1>} : memref<16x128xf32, #tpu.memory_space<vmem>>, vector<2x128xf32>
    %87 = arith.truncf %86 : vector<2x128xf32> to vector<2x128xbf16>
    %c0_80 = arith.constant 0 : index
    %c0_81 = arith.constant 0 : index
    %88 = vector.load %arg5[%c0_80, %c0_81] : memref<640x256xbf16, #tpu.memory_space<vmem>>, vector<128x256xbf16>
    %cst_82 = arith.constant dense<0.000000e+00> : vector<2x256xf32>
    %89 = tpu.matmul %87, %88, %cst_82 {dimension_numbers = #tpu.dot_dimension_numbers<[1], [0], [0], [1], [0, 0, 1, 1], [], []>} : vector<2x128xbf16>, vector<128x256xbf16>, vector<2x256xf32> -> vector<2x256xf32>
    %c1_83 = arith.constant 1 : index
    %c0_84 = arith.constant 0 : index
    %90 = tpu.strided_load %arg15[%c1_83, %c0_84] {strides = array<i32: 8, 1>} : memref<16x128xf32, #tpu.memory_space<vmem>>, vector<2x128xf32>
    %91 = arith.truncf %90 : vector<2x128xf32> to vector<2x128xbf16>
    %c128 = arith.constant 128 : index
    %c0_85 = arith.constant 0 : index
    %92 = vector.load %arg5[%c128, %c0_85] : memref<640x256xbf16, #tpu.memory_space<vmem>>, vector<128x256xbf16>
    %cst_86 = arith.constant dense<0.000000e+00> : vector<2x256xf32>
    %93 = tpu.matmul %91, %92, %cst_86 {dimension_numbers = #tpu.dot_dimension_numbers<[1], [0], [0], [1], [0, 0, 1, 1], [], []>} : vector<2x128xbf16>, vector<128x256xbf16>, vector<2x256xf32> -> vector<2x256xf32>
    %94 = arith.addf %89, %93 : vector<2x256xf32>
    %c2_87 = arith.constant 2 : index
    %c0_88 = arith.constant 0 : index
    %95 = tpu.strided_load %arg15[%c2_87, %c0_88] {strides = array<i32: 8, 1>} : memref<16x128xf32, #tpu.memory_space<vmem>>, vector<2x128xf32>
    %96 = arith.truncf %95 : vector<2x128xf32> to vector<2x128xbf16>
    %c256 = arith.constant 256 : index
    %c0_89 = arith.constant 0 : index
    %97 = vector.load %arg5[%c256, %c0_89] : memref<640x256xbf16, #tpu.memory_space<vmem>>, vector<128x256xbf16>
    %cst_90 = arith.constant dense<0.000000e+00> : vector<2x256xf32>
    %98 = tpu.matmul %96, %97, %cst_90 {dimension_numbers = #tpu.dot_dimension_numbers<[1], [0], [0], [1], [0, 0, 1, 1], [], []>} : vector<2x128xbf16>, vector<128x256xbf16>, vector<2x256xf32> -> vector<2x256xf32>
    %99 = arith.addf %94, %98 : vector<2x256xf32>
    %c3_91 = arith.constant 3 : index
    %c0_92 = arith.constant 0 : index
    %100 = tpu.strided_load %arg15[%c3_91, %c0_92] {strides = array<i32: 8, 1>} : memref<16x128xf32, #tpu.memory_space<vmem>>, vector<2x128xf32>
    %101 = arith.truncf %100 : vector<2x128xf32> to vector<2x128xbf16>
    %c384 = arith.constant 384 : index
    %c0_93 = arith.constant 0 : index
    %102 = vector.load %arg5[%c384, %c0_93] : memref<640x256xbf16, #tpu.memory_space<vmem>>, vector<128x256xbf16>
    %cst_94 = arith.constant dense<0.000000e+00> : vector<2x256xf32>
    %103 = tpu.matmul %101, %102, %cst_94 {dimension_numbers = #tpu.dot_dimension_numbers<[1], [0], [0], [1], [0, 0, 1, 1], [], []>} : vector<2x128xbf16>, vector<128x256xbf16>, vector<2x256xf32> -> vector<2x256xf32>
    %104 = arith.addf %99, %103 : vector<2x256xf32>
    %c4_95 = arith.constant 4 : index
    %c0_96 = arith.constant 0 : index
    %105 = tpu.strided_load %arg15[%c4_95, %c0_96] {strides = array<i32: 8, 1>} : memref<16x128xf32, #tpu.memory_space<vmem>>, vector<2x128xf32>
    %106 = arith.truncf %105 : vector<2x128xf32> to vector<2x128xbf16>
    %c512 = arith.constant 512 : index
    %c0_97 = arith.constant 0 : index
    %107 = vector.load %arg5[%c512, %c0_97] : memref<640x256xbf16, #tpu.memory_space<vmem>>, vector<128x256xbf16>
    %cst_98 = arith.constant dense<0.000000e+00> : vector<2x256xf32>
    %108 = tpu.matmul %106, %107, %cst_98 {dimension_numbers = #tpu.dot_dimension_numbers<[1], [0], [0], [1], [0, 0, 1, 1], [], []>} : vector<2x128xbf16>, vector<128x256xbf16>, vector<2x256xf32> -> vector<2x256xf32>
    %109 = arith.addf %104, %108 : vector<2x256xf32>
    %c0_99 = arith.constant 0 : index
    %c0_100 = arith.constant 0 : index
    %110 = vector.load %arg6[%c0_99, %c0_100] : memref<1x256xf32, #tpu.memory_space<vmem>>, vector<1x256xf32>
    %111 = vector.broadcast %110 : vector<1x256xf32> to vector<2x256xf32>
    %112 = arith.addf %109, %111 : vector<2x256xf32>
    %cst_101 = arith.constant 0.000000e+00 : f32
    %113 = vector.broadcast %cst_101 : f32 to vector<2x256xf32>
    %114 = arith.maximumf %112, %113 : vector<2x256xf32>
    %115 = arith.truncf %114 : vector<2x256xf32> to vector<2x256xbf16>
    %c0_102 = arith.constant 0 : index
    %c0_103 = arith.constant 0 : index
    %116 = vector.load %arg7[%c0_102, %c0_103] : memref<256x128xbf16, #tpu.memory_space<vmem>>, vector<256x128xbf16>
    %cst_104 = arith.constant dense<0.000000e+00> : vector<2x128xf32>
    %117 = tpu.matmul %115, %116, %cst_104 {dimension_numbers = #tpu.dot_dimension_numbers<[1], [0], [0], [1], [0, 0, 1, 1], [], []>} : vector<2x256xbf16>, vector<256x128xbf16>, vector<2x128xf32> -> vector<2x128xf32>
    %c0_105 = arith.constant 0 : index
    %c0_106 = arith.constant 0 : index
    %118 = vector.load %arg8[%c0_105, %c0_106] : memref<1x128xf32, #tpu.memory_space<vmem>>, vector<1x128xf32>
    %119 = vector.broadcast %118 : vector<1x128xf32> to vector<2x128xf32>
    %120 = arith.addf %117, %119 : vector<2x128xf32>
    %cst_107 = arith.constant 0.000000e+00 : f32
    %121 = vector.broadcast %cst_107 : f32 to vector<2x128xf32>
    %122 = arith.maximumf %120, %121 : vector<2x128xf32>
    %123 = arith.truncf %122 : vector<2x128xf32> to vector<2x128xbf16>
    %c0_108 = arith.constant 0 : index
    %c0_109 = arith.constant 0 : index
    %124 = vector.load %arg9[%c0_108, %c0_109] : memref<128x128xbf16, #tpu.memory_space<vmem>>, vector<128x128xbf16>
    %cst_110 = arith.constant dense<0.000000e+00> : vector<2x128xf32>
    %125 = tpu.matmul %123, %124, %cst_110 {dimension_numbers = #tpu.dot_dimension_numbers<[1], [0], [0], [1], [0, 0, 1, 1], [], []>} : vector<2x128xbf16>, vector<128x128xbf16>, vector<2x128xf32> -> vector<2x128xf32>
    %c0_111 = arith.constant 0 : index
    %c0_112 = arith.constant 0 : index
    %126 = vector.load %arg10[%c0_111, %c0_112] : memref<1x128xf32, #tpu.memory_space<vmem>>, vector<1x128xf32>
    %127 = vector.broadcast %126 : vector<1x128xf32> to vector<2x128xf32>
    %128 = arith.addf %125, %127 : vector<2x128xf32>
    %c0_113 = arith.constant 0 : index
    %c0_114 = arith.constant 0 : index
    %129 = vector.load %arg11[%c0_113, %c0_114] : memref<2x128xf32, #tpu.memory_space<vmem>>, vector<2x128xf32>
    tpu.vector_store %arg11[%c0_113, %c0_114], %128 {strides = array<i32>} : memref<2x128xf32, #tpu.memory_space<vmem>>, vector<2x128xf32>,
    return
  }
}

</mosaic_0001>

<bundles_post_ra>
// kernel: _forward_impl.1
= control target key start
LH: loop header
LB: loop body
LE: loop exit
PB: predicated region body
PF: predicated region fallthrough
CT: control target
= control target key end

     0   :  { %16 = vsyncpa [#allocation7], 0  ;;  %s4523_s0 = inlined_call_operand.vmem [shape: f32[72,128], index: 0, kind: input, shape index: {}]   ;;  %s4524_s1 = inlined_call_operand.vmem [shape: bf16[5,128,256], index: 1, kind: input, shape index: {}]   ;;  %s4525_s2 = inlined_call_operand.vmem [shape: f32[1,256], index: 2, kind: input, shape index: {}]   ;;  %s4526_s3 = inlined_call_operand.hbm [shape: bf16[5,128,256], index: 3, kind: input, shape index: {}]   ;;  %s4527_s4 = inlined_call_operand.vmem [shape: f32[1,256], index: 4, kind: input, shape index: {}]   ;;  %s4528_s5 = inlined_call_operand.hbm [shape: bf16[640,256], index: 5, kind: input, shape index: {}]   ;;  %s4529_s6 = inlined_call_operand.vmem [shape: f32[1,256], index: 6, kind: input, shape index: {}]   ;;  %s4530_s7 = inlined_call_operand.vmem [shape: bf16[256,128], index: 7, kind: input, shape index: {}]   ;;  %s4531_s8 = inlined_call_operand.vmem [shape: f32[1,128], index: 8, kind: input, shape index: {}]   ;;  %s4532_s9 = inlined_call_operand.vmem [shape: bf16[128,128], index: 9, kind: input, shape index: {}]   ;;  %s4533_s10 = inlined_call_operand.vmem [shape: f32[1,128], index: 10, kind: input, shape index: {}]   ;;  %s4534_s11 = inlined_call_operand.hbm [shape: f32[2,128], index: 11, kind: output, shape index: {}]  }
   0x1   :  { %17 = vsyncpa [#allocation10], 0 }
   0x2   :  { %18 = vsyncpa [#allocation8], 0  ;;  %s3827_s17 = smov [#allocation6]  }
   0x3   :  { %s30_s18 = sshll.u32 %s3827_s17, 4  ;;  %s31_s18 = int_to_ptr.vmem [resolvable:$true] %s30_s18 }
   0x4   :  { %s3769_s19 = scalar_lea.vmem %s31_s18, 10240  ;;  %p3774_p1 = scmp.lt.s32.totalorder %s31_s18, %s31_s18 }
   0x5   :  { %p3770_p0 = scmp.ne.s32.totalorder %s31_s18, %s3769_s19  ;;  %p3775_p2 = scmp.lt.s32.totalorder %s3769_s19, %s3769_s19 }
   0x7   :  { %p3776_p3 = por %p3775_p2, %p3774_p1 }
   0x9   :  { %p3777_p4 = pnand %p3776_p3, %p3770_p0 }
   0xb   :  { %3780 = shalt.err (!%p3777_p4)
}
   0xc   :  { %s3828_s20 = smov 128   ;;  %s3829_s21 = smov 8  }
   0xd   :  { %36 = dma.hbm_to_vmem [thread:$0]  %s4526_s3, 10240, %s31_s18, [#allocation7], %s3828_s20, %s3828_s20, %s3829_s21  }
   0xe   :  { %s3830_s24 = smov [#allocation9]  }
   0xf   :  { %s44_s25 = sshll.u32 %s3830_s24, 4  ;;  %s45_s25 = int_to_ptr.vmem [resolvable:$true] %s44_s25 }
  0x10   :  { %s3789_s26 = scalar_lea.vmem %s45_s25, 10240  ;;  %p3794_p6 = scmp.lt.s32.totalorder %s45_s25, %s45_s25 }
  0x11   :  { %p3790_p5 = scmp.ne.s32.totalorder %s45_s25, %s3789_s26  ;;  %p3795_p7 = scmp.lt.s32.totalorder %s3789_s26, %s3789_s26 }
  0x13   :  { %p3796_p8 = por %p3795_p7, %p3794_p6 }
  0x15   :  { %p3797_p9 = pnand %p3796_p8, %p3790_p5 }
  0x17   :  { %3800 = shalt.err (!%p3797_p9)
}
  0x18   :  { %50 = dma.hbm_to_vmem [thread:$0]  %s4528_s5, 10240, %s45_s25, [#allocation10], %s3828_s20, %s3828_s20, %s3829_s21  }
  0x19   :  { %3821 = dma.done.wait [#allocation7], 10240  }
  0x1a   :  { %3822 = vsyncadd [#allocation7], 4294957056 }
  0x1b   :  { %3823 = dma.done.wait [#allocation10], 10240  }
  0x1c   :  { %3824 = vsyncadd [#allocation10], 4294957056  ;;  %v4535_v0 = vmov 0   ;;  %v3376_v1 = vld [vmem:[%s4524_s1 + $0xf4] ss:$8 sps:$4 sm:$0xff]   ;;  %v96_v33 = vld [vmem:[%s4523_s0 + $0x1] sm:$0xff] }
  0x1d   :  { %237 = vmatprep.mubr.bf16.mxu0 %v4535_v0  ;;  %390 = vmatprep.mubr.bf16.mxu1 %v4535_v0  ;;  %v3378_v2 = vld [vmem:[%s4524_s1 + $0x74] ss:$8 sps:$4 sm:$0xff]   ;;  %v3380_v3 = vld [vmem:[%s4524_s1 + $0xf0] ss:$8 sps:$4 sm:$0xff]   ;;  %v3382_v5 = vld [vmem:[%s4524_s1 + $0xe4] ss:$8 sps:$4 sm:$0xff]  }
  0x1e   :  { %205 = vmatprep.subr.bf16.mxu0 %v3376_v1  ;;  %v3381_v4 = vld [vmem:[%s4524_s1 + $0x70] ss:$8 sps:$4 sm:$0xff]   ;;  %358 = vmatprep.subr.bf16.mxu1 %v3378_v2  ;;  %v3384_v6 = vld [vmem:[%s4524_s1 + $0x64] ss:$8 sps:$4 sm:$0xff]   ;;  %v3386_v7 = vld [vmem:[%s4524_s1 + $0xe0] ss:$8 sps:$4 sm:$0xff]  }
  0x1f   :  { %206 = vmatpush1.bf16.msra.mxu0 %v3380_v3  ;;  %359 = vmatpush1.bf16.msra.mxu1 %v3381_v4  ;;  %v3387_v8 = vld [vmem:[%s4524_s1 + $0x60] ss:$8 sps:$4 sm:$0xff]   ;;  %v3388_v9 = vld [vmem:[%s4524_s1 + $0xd4] ss:$8 sps:$4 sm:$0xff]   ;;  %v3392_v11 = vld [vmem:[%s4524_s1 + $0xd0] ss:$8 sps:$4 sm:$0xff]  }
  0x20   :  { %207 = vmatprep.subr.bf16.mxu0 %v3382_v5  ;;  %360 = vmatprep.subr.bf16.mxu1 %v3384_v6  ;;  %v3390_v10 = vld [vmem:[%s4524_s1 + $0x54] ss:$8 sps:$4 sm:$0xff]   ;;  %v3393_v12 = vld [vmem:[%s4524_s1 + $0x50] ss:$8 sps:$4 sm:$0xff]   ;;  %v3394_v13 = vld [vmem:[%s4524_s1 + $0xc4] ss:$8 sps:$4 sm:$0xff]  }
  0x21   :  { %v3396_v14 = vld [vmem:[%s4524_s1 + $0x44] ss:$8 sps:$4 sm:$0xff]   ;;  %v3398_v15 = vld [vmem:[%s4524_s1 + $0xc0] ss:$8 sps:$4 sm:$0xff]   ;;  %v3400_v17 = vld [vmem:[%s4524_s1 + $0xb4] ss:$8 sps:$4 sm:$0xff]  }
  0x22   :  { %v3399_v16 = vld [vmem:[%s4524_s1 + $0x40] ss:$8 sps:$4 sm:$0xff]   ;;  %v3402_v18 = vld [vmem:[%s4524_s1 + $0x34] ss:$8 sps:$4 sm:$0xff]   ;;  %v3404_v19 = vld [vmem:[%s4524_s1 + $0xb0] ss:$8 sps:$4 sm:$0xff]  }
  0x23   :  { %208 = vmatpush1.bf16.msra.mxu0 %v3386_v7  ;;  %361 = vmatpush1.bf16.msra.mxu1 %v3387_v8  ;;  %v3405_v20 = vld [vmem:[%s4524_s1 + $0x30] ss:$8 sps:$4 sm:$0xff]   ;;  %v3406_v21 = vld [vmem:[%s4524_s1 + $0xa4] ss:$8 sps:$4 sm:$0xff]   ;;  %v3410_v23 = vld [vmem:[%s4524_s1 + $0xa0] ss:$8 sps:$4 sm:$0xff]  }
  0x24   :  { %209 = vmatprep.subr.bf16.mxu0 %v3388_v9  ;;  %362 = vmatprep.subr.bf16.mxu1 %v3390_v10  ;;  %v3408_v22 = vld [vmem:[%s4524_s1 + $0x24] ss:$8 sps:$4 sm:$0xff]   ;;  %v3411_v24 = vld [vmem:[%s4524_s1 + $0x20] ss:$8 sps:$4 sm:$0xff]   ;;  %v3412_v25 = vld [vmem:[%s4524_s1 + $0x94] ss:$8 sps:$4 sm:$0xff]  }
  0x25   :  { %v3414_v26 = vld [vmem:[%s4524_s1 + $0x14] ss:$8 sps:$4 sm:$0xff]   ;;  %v3416_v27 = vld [vmem:[%s4524_s1 + $0x90] ss:$8 sps:$4 sm:$0xff]   ;;  %v3418_v29 = vld [vmem:[%s4524_s1 + $0x84] ss:$8 sps:$4 sm:$0xff]  }
  0x26   :  { %v3417_v28 = vld [vmem:[%s4524_s1 + $0x10] ss:$8 sps:$4 sm:$0xff]   ;;  %v3420_v30 = vld [vmem:[%s4524_s1 + $0x4] ss:$8 sps:$4 sm:$0xff]   ;;  %v3422_v31 = vld [vmem:[%s4524_s1 + $0x80] ss:$8 sps:$4 sm:$0xff]  }
  0x27   :  { %210 = vmatpush1.bf16.msra.mxu0 %v3392_v11  ;;  %363 = vmatpush1.bf16.msra.mxu1 %v3393_v12  ;;  %v3423_v32 = vld [vmem:[%s4524_s1] ss:$8 sps:$4 sm:$0xff]   ;;  %v3426_v37 = vld [vmem:[%s4524_s1 + $0x174] ss:$8 sps:$4 sm:$0xff]   ;;  %v3424_v41 = vld [vmem:[%s4524_s1 + $0x170] ss:$8 sps:$4 sm:$0xff]  }
  0x28   :  { %211 = vmatprep.subr.bf16.mxu0 %v3394_v13  ;;  %364 = vmatprep.subr.bf16.mxu1 %v3396_v14  ;;  %v97_v34 = vld [vmem:[%s4523_s0 + $0x9] sm:$0xff]  ;;  %v68_v35 = vld [vmem:[%s4523_s0] sm:$0xff]  ;;  %v3429_v38 = vld [vmem:[%s4524_s1 + $0x1f4] ss:$8 sps:$4 sm:$0xff]   ;;  %vm3833_vm0 = vmmov 0  }
  0x29   :  { %v69_v36 = vld [vmem:[%s4523_s0 + $0x8] sm:$0xff]  ;;  %v104_v39 = vpack.c.bf16 %v97_v34, %v96_v33  ;;  %v3427_v42 = vld [vmem:[%s4524_s1 + $0x1f0] ss:$8 sps:$4 sm:$0xff]   ;;  %v3438_v51 = vld [vmem:[%s4524_s1 + $0x154] ss:$8 sps:$4 sm:$0xff]  }
  0x2a   :  { %v76_v40 = vpack.c.bf16 %v69_v36, %v68_v35  ;;  %v3432_v43 = vld [vmem:[%s4524_s1 + $0x164] ss:$8 sps:$4 sm:$0xff]   ;;  %v3430_v45 = vld [vmem:[%s4524_s1 + $0x160] ss:$8 sps:$4 sm:$0xff]   ;;  %v98_v47 = vld [vmem:[%s4523_s0 + $0x11] sm:$0xff] }
  0x2b   :  { %212 = vmatpush1.bf16.msra.mxu0 %v3398_v15  ;;  %365 = vmatpush1.bf16.msra.mxu1 %v3399_v16  ;;  %v3435_v44 = vld [vmem:[%s4524_s1 + $0x1e4] ss:$8 sps:$4 sm:$0xff]   ;;  %v3433_v46 = vld [vmem:[%s4524_s1 + $0x1e0] ss:$8 sps:$4 sm:$0xff]   ;;  %v70_v49 = vld [vmem:[%s4523_s0 + $0x10] sm:$0xff] }
  0x2c   :  { %213 = vmatprep.subr.bf16.mxu0 %v3400_v17  ;;  %366 = vmatprep.subr.bf16.mxu1 %v3402_v18  ;;  %v99_v48 = vld [vmem:[%s4523_s0 + $0x19] sm:$0xff]  ;;  %v3444_v57 = vld [vmem:[%s4524_s1 + $0x144] ss:$8 sps:$4 sm:$0xff]   ;;  %v102_v12 = vld [vmem:[%s4523_s0 + $0x31] sm:$0xff] }
  0x2d   :  { %v71_v50 = vld [vmem:[%s4523_s0 + $0x18] sm:$0xff]  ;;  %v105_v53 = vpack.c.bf16 %v99_v48, %v98_v47  ;;  %v3447_v58 = vld [vmem:[%s4524_s1 + $0x1c4] ss:$8 sps:$4 sm:$0xff]   ;;  %v3442_v59 = vld [vmem:[%s4524_s1 + $0x140] ss:$8 sps:$4 sm:$0xff]  }
  0x2e   :  { %v3441_v52 = vld [vmem:[%s4524_s1 + $0x1d4] ss:$8 sps:$4 sm:$0xff]   ;;  %v77_v54 = vpack.c.bf16 %v71_v50, %v70_v49  ;;  %v3436_v55 = vld [vmem:[%s4524_s1 + $0x150] ss:$8 sps:$4 sm:$0xff]   ;;  %v3445_v60 = vld [vmem:[%s4524_s1 + $0x1c0] ss:$8 sps:$4 sm:$0xff]  }
  0x2f   :  { %214 = vmatpush1.bf16.msra.mxu0 %v3404_v19  ;;  %367 = vmatpush1.bf16.msra.mxu1 %v3405_v20  ;;  %v3439_v56 = vld [vmem:[%s4524_s1 + $0x1d0] ss:$8 sps:$4 sm:$0xff]   ;;  %v100_v61 = vld [vmem:[%s4523_s0 + $0x21] sm:$0xff]  ;;  %v3450_v2 = vld [vmem:[%s4524_s1 + $0x134] ss:$8 sps:$4 sm:$0xff]  }
  0x30   :  { %215 = vmatprep.subr.bf16.mxu0 %v3406_v21  ;;  %368 = vmatprep.subr.bf16.mxu1 %v3408_v22  ;;  %v101_v62 = vld [vmem:[%s4523_s0 + $0x29] sm:$0xff]  ;;  %v72_v63 = vld [vmem:[%s4523_s0 + $0x20] sm:$0xff]  ;;  %v3453_v3 = vld [vmem:[%s4524_s1 + $0x1b4] ss:$8 sps:$4 sm:$0xff]  }
  0x31   :  { %v73_v1 = vld [vmem:[%s4523_s0 + $0x28] sm:$0xff]  ;;  %v106_v4 = vpack.c.bf16 %v101_v62, %v100_v61  ;;  %v3448_v6 = vld [vmem:[%s4524_s1 + $0x130] ss:$8 sps:$4 sm:$0xff]   ;;  %v3462_v16 = vld [vmem:[%s4524_s1 + $0x114] ss:$8 sps:$4 sm:$0xff]  }
  0x32   :  { %v78_v5 = vpack.c.bf16 %v73_v1, %v72_v63  ;;  %v3451_v7 = vld [vmem:[%s4524_s1 + $0x1b0] ss:$8 sps:$4 sm:$0xff]   ;;  %v3456_v8 = vld [vmem:[%s4524_s1 + $0x124] ss:$8 sps:$4 sm:$0xff]   ;;  %v3454_v10 = vld [vmem:[%s4524_s1 + $0x120] ss:$8 sps:$4 sm:$0xff]  }
  0x33   :  { %216 = vmatpush1.bf16.msra.mxu0 %v3410_v23  ;;  %369 = vmatpush1.bf16.msra.mxu1 %v3411_v24  ;;  %v3459_v9 = vld [vmem:[%s4524_s1 + $0x1a4] ss:$8 sps:$4 sm:$0xff]   ;;  %v3457_v11 = vld [vmem:[%s4524_s1 + $0x1a0] ss:$8 sps:$4 sm:$0xff]   ;;  %v74_v14 = vld [vmem:[%s4523_s0 + $0x30] sm:$0xff] }
  0x34   :  { %217 = vmatprep.subr.bf16.mxu0 %v3412_v25  ;;  %370 = vmatprep.subr.bf16.mxu1 %v3414_v26  ;;  %v103_v13 = vld [vmem:[%s4523_s0 + $0x39] sm:$0xff]  ;;  %v3468_v22 = vld [vmem:[%s4524_s1 + $0x104] ss:$8 sps:$4 sm:$0xff]  }
  0x35   :  { %v75_v15 = vld [vmem:[%s4523_s0 + $0x38] sm:$0xff]  ;;  %v107_v18 = vpack.c.bf16 %v103_v13, %v102_v12  ;;  %v3471_v23 = vld [vmem:[%s4524_s1 + $0x184] ss:$8 sps:$4 sm:$0xff]   ;;  %v3466_v24 = vld [vmem:[%s4524_s1 + $0x100] ss:$8 sps:$4 sm:$0xff]  }
  0x36   :  { %v3465_v17 = vld [vmem:[%s4524_s1 + $0x194] ss:$8 sps:$4 sm:$0xff]   ;;  %v79_v19 = vpack.c.bf16 %v75_v15, %v74_v14  ;;  %v3460_v20 = vld [vmem:[%s4524_s1 + $0x110] ss:$8 sps:$4 sm:$0xff]   ;;  %v3469_v25 = vld [vmem:[%s4524_s1 + $0x180] ss:$8 sps:$4 sm:$0xff]  }
  0x37   :  { %218 = vmatpush1.bf16.msra.mxu0 %v3416_v27  ;;  %371 = vmatpush1.bf16.msra.mxu1 %v3417_v28  ;;  %v3463_v21 = vld [vmem:[%s4524_s1 + $0x190] ss:$8 sps:$4 sm:$0xff]   ;;  %v431_v26 = vld [vmem:[%s4523_s0 + $0x2] sm:$0xff]  ;;  %v3486_v50 = vld [vmem:[%s4524_s1 + $0x234] ss:$8 sps:$4 sm:$0xff]  }
  0x38   :  { %219 = vmatprep.subr.bf16.mxu0 %v3418_v29  ;;  %372 = vmatprep.subr.bf16.mxu1 %v3420_v30  ;;  %v432_v27 = vld [vmem:[%s4523_s0 + $0xa] sm:$0xff]  ;;  %v3474_v30 = vld [vmem:[%s4524_s1 + $0x274] ss:$8 sps:$4 sm:$0xff]  }
  0x39   :  { %v629_v28 = vld [vmem:[%s4523_s0 + $0x3] sm:$0xff]  ;;  %v630_v29 = vld [vmem:[%s4523_s0 + $0xb] sm:$0xff]  ;;  %v833_v12 = vld [vmem:[%s4523_s0 + $0x34] sm:$0xff] }
  0x3a   :  { %v3472_v33 = vld [vmem:[%s4524_s1 + $0x270] ss:$8 sps:$4 sm:$0xff]   ;;  %v3477_v34 = vld [vmem:[%s4524_s1 + $0x264] ss:$8 sps:$4 sm:$0xff]   ;;  %v3475_v35 = vld [vmem:[%s4524_s1 + $0x260] ss:$8 sps:$4 sm:$0xff]  }
  0x3b   :  { %220 = vmatpush1.bf16.msra.mxu0 %v3422_v31  ;;  %373 = vmatpush1.bf16.msra.mxu1 %v3423_v32  ;;  %v439_v31 = vpack.c.bf16 %v432_v27, %v431_v26  ;;  %v637_v32 = vpack.c.bf16 %v630_v29, %v629_v28  ;;  %v433_v36 = vld [vmem:[%s4523_s0 + $0x12] sm:$0xff]  ;;  %v436_v47 = vld [vmem:[%s4523_s0 + $0x2a] sm:$0xff]  ;;  %v834_v13 = vld [vmem:[%s4523_s0 + $0x3c] sm:$0xff] }
  0x3c   :  { %540 = vmatprep.subr.bf16.mxu0 %v3426_v37  ;;  %738 = vmatprep.subr.bf16.mxu1 %v3429_v38  ;;  %v434_v37 = vld [vmem:[%s4523_s0 + $0x1a] sm:$0xff]  ;;  %v633_v48 = vld [vmem:[%s4523_s0 + $0x23] sm:$0xff]  ;;  %v634_v49 = vld [vmem:[%s4523_s0 + $0x2b] sm:$0xff]  ;;  %v838_v14 = vpack.c.bf16 %v834_v13, %v833_v12 }
  0x3d   :  { %v631_v38 = vld [vmem:[%s4523_s0 + $0x13] sm:$0xff]  ;;  %v3495_v1 = vld [vmem:[%s4524_s1 + $0x204] ss:$8 sps:$4 sm:$0xff]  }
  0x3e   :  { %238 = vmatmul.mubr.bf16.vlgmr.msra.gmra.mxu0 %v104_v39  ;;  %391 = vmatmul.mubr.bf16.vlgmr.msra.gmra.mxu1 %v76_v40  ;;  %v632_v39 = vld [vmem:[%s4523_s0 + $0x1b] sm:$0xff]  ;;  %v3498_v15 = vld [vmem:[#allocation6 + $0x74] ss:$8 sps:$4 sm:$0xff]   ;;  %v3517_v26 = vld [vmem:[#allocation6 + $0x30] ss:$8 sps:$4 sm:$0xff]  }
  0x3f   :  { %541 = vmatpush1.bf16.msra.mxu0 %v3424_v41  ;;  %739 = vmatpush1.bf16.msra.mxu1 %v3427_v42  ;;  %v3480_v40 = vld [vmem:[%s4524_s1 + $0x254] ss:$8 sps:$4 sm:$0xff]   ;;  %v3478_v41 = vld [vmem:[%s4524_s1 + $0x250] ss:$8 sps:$4 sm:$0xff]   ;;  %v440_v42 = vpack.c.bf16 %v434_v37, %v433_v36 }
  0x40   :  { %542 = vmatprep.subr.bf16.mxu0 %v3432_v43  ;;  %740 = vmatprep.subr.bf16.mxu1 %v3435_v44  ;;  %v638_v43 = vpack.c.bf16 %v632_v39, %v631_v38  ;;  %v3483_v44 = vld [vmem:[%s4524_s1 + $0x244] ss:$8 sps:$4 sm:$0xff]   ;;  %v3490_v61 = vld [vmem:[%s4524_s1 + $0x210] ss:$8 sps:$4 sm:$0xff]  }
  0x41   :  { %247 = vmatprep.mubr.bf16.mxu0 %v4535_v0  ;;  %400 = vmatprep.mubr.bf16.mxu1 %v4535_v0  ;;  %v3510_v27 = vld [vmem:[#allocation6 + $0xe4] ss:$8 sps:$4 sm:$0xff]   ;;  %v3508_v29 = vld [vmem:[#allocation6 + $0xe0] ss:$8 sps:$4 sm:$0xff]   ;;  %v3528_v39 = vld [vmem:[#allocation6 + $0xb4] ss:$8 sps:$4 sm:$0xff]  }
  0x42   :  { %v3525_v28 = vld [vmem:[#allocation6 + $0x24] ss:$8 sps:$4 sm:$0xff]   ;;  %v3520_v37 = vld [vmem:[#allocation6 + $0xc0] ss:$8 sps:$4 sm:$0xff]  }
  0x43   :  { %543 = vmatpush1.bf16.msra.mxu0 %v3430_v45  ;;  %741 = vmatpush1.bf16.msra.mxu1 %v3433_v46  ;;  %v3481_v45 = vld [vmem:[%s4524_s1 + $0x240] ss:$8 sps:$4 sm:$0xff]   ;;  %v3537_v36 = vld [vmem:[#allocation6 + $0x4] ss:$8 sps:$4 sm:$0xff]  }
  0x44   :  { %544 = vmatprep.subr.bf16.mxu0 %v3438_v51  ;;  %742 = vmatprep.subr.bf16.mxu1 %v3441_v52  ;;  %v435_v46 = vld [vmem:[%s4523_s0 + $0x22] sm:$0xff]  ;;  %v3484_v51 = vld [vmem:[%s4524_s1 + $0x230] ss:$8 sps:$4 sm:$0xff]  }
  0x45   :  { %v441_v52 = vpack.c.bf16 %v436_v47, %v435_v46  ;;  %v3535_v38 = vld [vmem:[#allocation6] ss:$8 sps:$4 sm:$0xff]   ;;  %v3546_v46 = vld [vmem:[#allocation6 + $0x84] ss:$8 sps:$4 sm:$0xff]  }
  0x46   :  { %248 = vmatmul.mubr.bf16.gmra.mxu0 %v105_v53  ;;  %401 = vmatmul.mubr.bf16.gmra.mxu1 %v77_v54  ;;  %v639_v53 = vpack.c.bf16 %v634_v49, %v633_v48  ;;  %v3489_v54 = vld [vmem:[%s4524_s1 + $0x224] ss:$8 sps:$4 sm:$0xff]   ;;  %v3544_v47 = vld [vmem:[#allocation6 + $0x80] ss:$8 sps:$4 sm:$0xff]   ;;  %v3832_v49 = vmov 0.0  }
  0x47   :  { %545 = vmatpush1.bf16.msra.mxu0 %v3436_v55  ;;  %743 = vmatpush1.bf16.msra.mxu1 %v3439_v56  ;;  %v3487_v55 = vld [vmem:[%s4524_s1 + $0x220] ss:$8 sps:$4 sm:$0xff]   ;;  %v437_v56 = vld [vmem:[%s4523_s0 + $0x32] sm:$0xff]  ;;  %1108 = vst [vmem:[#allocation3 + $0x20] sm:$0xff] %v3832_v49 }
  0x48   :  { %546 = vmatprep.subr.bf16.mxu0 %v3444_v57  ;;  %744 = vmatprep.subr.bf16.mxu1 %v3447_v58  ;;  %v438_v57 = vld [vmem:[%s4523_s0 + $0x3a] sm:$0xff]  ;;  %v3552_v48 = vld [vmem:[#allocation6 + $0x174] ss:$8 sps:$4 sm:$0xff]  }
  0x49   :  { %257 = vmatprep.mubr.bf16.mxu0 %v4535_v0  ;;  %410 = vmatprep.mubr.bf16.mxu1 %v4535_v0  ;;  %v635_v58 = vld [vmem:[%s4523_s0 + $0x33] sm:$0xff]  ;;  %v442_v62 = vpack.c.bf16 %v438_v57, %v437_v56 }
  0x4b   :  { %547 = vmatpush1.bf16.msra.mxu0 %v3442_v59  ;;  %745 = vmatpush1.bf16.msra.mxu1 %v3445_v60  ;;  %v636_v59 = vld [vmem:[%s4523_s0 + $0x3b] sm:$0xff] }
  0x4c   :  { %548 = vmatprep.subr.bf16.mxu0 %v3450_v2  ;;  %746 = vmatprep.subr.bf16.mxu1 %v3453_v3  ;;  %v3492_v60 = vld [vmem:[%s4524_s1 + $0x214] ss:$8 sps:$4 sm:$0xff]   ;;  %v640_v63 = vpack.c.bf16 %v636_v59, %v635_v58  ;;  %v3493_v2 = vld [vmem:[%s4524_s1 + $0x200] ss:$8 sps:$4 sm:$0xff]  }
  0x4d   :  { %v827_v3 = vld [vmem:[%s4523_s0 + $0x4] sm:$0xff] }
  0x4e   :  { %258 = vmatmul.mubr.bf16.gmra.mxu0 %v106_v4  ;;  %411 = vmatmul.mubr.bf16.gmra.mxu1 %v78_v5  ;;  %v828_v4 = vld [vmem:[%s4523_s0 + $0xc] sm:$0xff] }
  0x4f   :  { %549 = vmatpush1.bf16.msra.mxu0 %v3448_v6  ;;  %747 = vmatpush1.bf16.msra.mxu1 %v3451_v7  ;;  %v835_v5 = vpack.c.bf16 %v828_v4, %v827_v3  ;;  %v829_v6 = vld [vmem:[%s4523_s0 + $0x14] sm:$0xff]  ;;  %v830_v7 = vld [vmem:[%s4523_s0 + $0x1c] sm:$0xff] }
  0x50   :  { %550 = vmatprep.subr.bf16.mxu0 %v3456_v8  ;;  %748 = vmatprep.subr.bf16.mxu1 %v3459_v9  ;;  %v836_v8 = vpack.c.bf16 %v830_v7, %v829_v6  ;;  %v831_v9 = vld [vmem:[%s4523_s0 + $0x24] sm:$0xff] }
  0x51   :  { %267 = vmatprep.mubr.bf16.mxu0 %v4535_v0  ;;  %420 = vmatprep.mubr.bf16.mxu1 %v4535_v0 }
  0x53   :  { %551 = vmatpush1.bf16.msra.mxu0 %v3454_v10  ;;  %749 = vmatpush1.bf16.msra.mxu1 %v3457_v11  ;;  %v832_v10 = vld [vmem:[%s4523_s0 + $0x2c] sm:$0xff] }
  0x54   :  { %552 = vmatprep.subr.bf16.mxu0 %v3462_v16  ;;  %750 = vmatprep.subr.bf16.mxu1 %v3465_v17  ;;  %v837_v11 = vpack.c.bf16 %v832_v10, %v831_v9  ;;  %v3496_v16 = vld [vmem:[#allocation6 + $0x70] ss:$8 sps:$4 sm:$0xff]   ;;  %v3501_v17 = vld [vmem:[#allocation6 + $0x64] ss:$8 sps:$4 sm:$0xff]  }
  0x56   :  { %268 = vmatmul.mubr.bf16.gmra.mxu0 %v107_v18  ;;  %421 = vmatmul.mubr.bf16.gmra.mxu1 %v79_v19  ;;  %v3499_v18 = vld [vmem:[#allocation6 + $0x60] ss:$8 sps:$4 sm:$0xff]   ;;  %v3507_v19 = vld [vmem:[#allocation6 + $0x54] ss:$8 sps:$4 sm:$0xff]  }
  0x57   :  { %553 = vmatpush1.bf16.msra.mxu0 %v3460_v20  ;;  %751 = vmatpush1.bf16.msra.mxu1 %v3463_v21  ;;  %v3505_v20 = vld [vmem:[#allocation6 + $0x50] ss:$8 sps:$4 sm:$0xff]   ;;  %v3513_v21 = vld [vmem:[#allocation6 + $0x44] ss:$8 sps:$4 sm:$0xff]  }
  0x58   :  { %554 = vmatprep.subr.bf16.mxu0 %v3468_v22  ;;  %752 = vmatprep.subr.bf16.mxu1 %v3471_v23  ;;  %v3511_v22 = vld [vmem:[#allocation6 + $0x40] ss:$8 sps:$4 sm:$0xff]   ;;  %v3504_v23 = vld [vmem:[#allocation6 + $0xf4] ss:$8 sps:$4 sm:$0xff]  }
  0x59   :  { %572 = vmatprep.mubr.bf16.mxu0 %v4535_v0  ;;  %770 = vmatprep.mubr.bf16.mxu1 %v4535_v0 }
  0x5b   :  { %555 = vmatpush1.bf16.msra.mxu0 %v3466_v24  ;;  %753 = vmatpush1.bf16.msra.mxu1 %v3469_v25  ;;  %v3519_v24 = vld [vmem:[#allocation6 + $0x34] ss:$8 sps:$4 sm:$0xff]   ;;  %v3502_v25 = vld [vmem:[#allocation6 + $0xf0] ss:$8 sps:$4 sm:$0xff]  }
  0x5c   :  { %936 = vmatprep.subr.bf16.mxu0 %v3474_v30  ;;  %1234 = vmatprep.subr.bf16.mxu1 %v3504_v23  ;;  %v3523_v30 = vld [vmem:[#allocation6 + $0x20] ss:$8 sps:$4 sm:$0xff]  }
  0x5e   :  { %573 = vmatmul.mubr.bf16.vlgmr.msra.gmra.mxu0 %v439_v31  ;;  %771 = vmatmul.mubr.bf16.vlgmr.msra.gmra.mxu1 %v637_v32  ;;  %v3516_v31 = vld [vmem:[#allocation6 + $0xd4] ss:$8 sps:$4 sm:$0xff]  }
  0x5f   :  { %937 = vmatpush1.bf16.msra.mxu0 %v3472_v33  ;;  %582 = vmatprep.mubr.bf16.mxu0 %v4535_v0  ;;  %v3531_v32 = vld [vmem:[#allocation6 + $0x14] ss:$8 sps:$4 sm:$0xff]   ;;  %v3514_v33 = vld [vmem:[#allocation6 + $0xd0] ss:$8 sps:$4 sm:$0xff]  }
  0x60   :  { %938 = vmatprep.subr.bf16.mxu0 %v3477_v34  ;;  %780 = vmatprep.mubr.bf16.mxu1 %v4535_v0  ;;  %v3529_v34 = vld [vmem:[#allocation6 + $0x10] ss:$8 sps:$4 sm:$0xff]  }
  0x61   :  { %1235 = vmatpush1.bf16.msra.mxu1 %v3502_v25 }
  0x62   :  { %1236 = vmatprep.subr.bf16.mxu1 %v3510_v27 }
  0x63   :  { %939 = vmatpush1.bf16.msra.mxu0 %v3475_v35  ;;  %v3522_v35 = vld [vmem:[#allocation6 + $0xc4] ss:$8 sps:$4 sm:$0xff]  }
  0x64   :  { %940 = vmatprep.subr.bf16.mxu0 %v3480_v40  ;;  %v3543_v40 = vld [vmem:[#allocation6 + $0x1f4] ss:$8 sps:$4 sm:$0xff]  }
  0x65   :  { %1237 = vmatpush1.bf16.msra.mxu1 %v3508_v29 }
  0x66   :  { %583 = vmatmul.mubr.bf16.gmra.mxu0 %v440_v42  ;;  %781 = vmatmul.mubr.bf16.gmra.mxu1 %v638_v43  ;;  %v3534_v42 = vld [vmem:[#allocation6 + $0xa4] ss:$8 sps:$4 sm:$0xff]   ;;  %v3532_v43 = vld [vmem:[#allocation6 + $0xa0] ss:$8 sps:$4 sm:$0xff]  }
  0x67   :  { %941 = vmatpush1.bf16.msra.mxu0 %v3478_v41  ;;  %592 = vmatprep.mubr.bf16.mxu0 %v4535_v0  ;;  %v3526_v41 = vld [vmem:[#allocation6 + $0xb0] ss:$8 sps:$4 sm:$0xff]  }
  0x68   :  { %942 = vmatprep.subr.bf16.mxu0 %v3483_v44  ;;  %790 = vmatprep.mubr.bf16.mxu1 %v4535_v0  ;;  %v3540_v44 = vld [vmem:[#allocation6 + $0x94] ss:$8 sps:$4 sm:$0xff]  }
  0x69   :  { %1238 = vmatprep.subr.bf16.mxu1 %v3516_v31 }
  0x6a   :  { %1239 = vmatpush1.bf16.msra.mxu1 %v3514_v33 }
  0x6b   :  { %943 = vmatpush1.bf16.msra.mxu0 %v3481_v45  ;;  %1240 = vmatprep.subr.bf16.mxu1 %v3522_v35  ;;  %v3538_v45 = vld [vmem:[#allocation6 + $0x90] ss:$8 sps:$4 sm:$0xff]   ;;  %v1027_v35 = vlaneseq }
  0x6c   :  { %944 = vmatprep.subr.bf16.mxu0 %v3486_v50 }
  0x6e   :  { %593 = vmatmul.mubr.bf16.gmra.mxu0 %v441_v52  ;;  %791 = vmatmul.mubr.bf16.gmra.mxu1 %v639_v53 }
  0x6f   :  { %945 = vmatpush1.bf16.msra.mxu0 %v3484_v51  ;;  %602 = vmatprep.mubr.bf16.mxu0 %v4535_v0 }
  0x70   :  { %946 = vmatprep.subr.bf16.mxu0 %v3489_v54  ;;  %800 = vmatprep.mubr.bf16.mxu1 %v4535_v0 }
  0x71   :  { %1241 = vmatpush1.bf16.msra.mxu1 %v3520_v37 }
  0x72   :  { %1242 = vmatprep.subr.bf16.mxu1 %v3528_v39  ;;  %v1028_v39 = vshrl.u32 %v1027_v35, 7 }
  0x73   :  { %947 = vmatpush1.bf16.msra.mxu0 %v3487_v55 }
  0x74   :  { %948 = vmatprep.subr.bf16.mxu0 %v3492_v60  ;;  %v4350_v35 = vsub.s32 1, %v1028_v39 }
  0x75   :  { %1243 = vmatpush1.bf16.msra.mxu1 %v3526_v41 }
  0x76   :  { %603 = vmatmul.mubr.bf16.gmra.mxu0 %v442_v62  ;;  %801 = vmatmul.mubr.bf16.gmra.mxu1 %v640_v63 }
  0x77   :  { %949 = vmatpush1.bf16.msra.mxu0 %v3490_v61  ;;  %968 = vmatprep.mubr.bf16.mxu0 %v4535_v0 }
  0x78   :  { %950 = vmatprep.subr.bf16.mxu0 %v3495_v1  ;;  %1266 = vmatprep.mubr.bf16.mxu1 %v4535_v0 }
  0x79   :  { %1244 = vmatprep.subr.bf16.mxu1 %v3534_v42 }
  0x7a   :  { %1245 = vmatpush1.bf16.msra.mxu1 %v3532_v43 }
  0x7b   :  { %951 = vmatpush1.bf16.msra.mxu0 %v3493_v2  ;;  %1246 = vmatprep.subr.bf16.mxu1 %v3540_v44 }
  0x7c   :  { %1367 = vmatprep.subr.bf16.mxu0 %v3498_v15 }
  0x7e   :  { %969 = vmatmul.mubr.bf16.vlgmr.msra.gmra.mxu0 %v835_v5  ;;  %1247 = vmatpush1.bf16.msra.mxu1 %v3538_v45 }
  0x7f   :  { %978 = vmatprep.mubr.bf16.mxu0 %v4535_v0  ;;  %1368 = vmatpush1.bf16.msra.mxu0 %v3496_v16 }
  0x80   :  { %1369 = vmatprep.subr.bf16.mxu0 %v3501_v17  ;;  %1248 = vmatprep.subr.bf16.mxu1 %v3546_v46  ;;  %v4343_v46 = vsub.s32 0, %v1028_v39 }
  0x82   :  { %1249 = vmatpush1.bf16.msra.mxu1 %v3544_v47 }
  0x83   :  { %1370 = vmatpush1.bf16.msra.mxu0 %v3499_v18  ;;  %1523 = vmatprep.subr.bf16.mxu1 %v3552_v48  ;;  %v1025_v48 = vld [vmem:[%s4525_s2] sm:$0x3] }
  0x84   :  { %1371 = vmatprep.subr.bf16.mxu0 %v3507_v19 }
  0x86   :  { %979 = vmatmul.mubr.bf16.gmra.mxu0 %v836_v8 }
  0x87   :  { %988 = vmatprep.mubr.bf16.mxu0 %v4535_v0  ;;  %1372 = vmatpush1.bf16.msra.mxu0 %v3505_v20 }
  0x88   :  { %1373 = vmatprep.subr.bf16.mxu0 %v3513_v21 }
  0x8b   :  { %1374 = vmatpush1.bf16.msra.mxu0 %v3511_v22 }
  0x8c   :  { %1375 = vmatprep.subr.bf16.mxu0 %v3519_v24 }
  0x8e   :  { %989 = vmatmul.mubr.bf16.gmra.mxu0 %v837_v11 }
  0x8f   :  { %998 = vmatprep.mubr.bf16.mxu0 %v4535_v0  ;;  %1376 = vmatpush1.bf16.msra.mxu0 %v3517_v26 }
  0x90   :  { %1377 = vmatprep.subr.bf16.mxu0 %v3525_v28 }
  0x93   :  { %1378 = vmatpush1.bf16.msra.mxu0 %v3523_v30 }
  0x94   :  { %1379 = vmatprep.subr.bf16.mxu0 %v3531_v32 }
  0x96   :  { %999 = vmatmul.mubr.bf16.gmra.mxu0 %v838_v14 }
  0x97   :  { %1399 = vmatprep.mubr.bf16.mxu0 %v4535_v0  ;;  %1380 = vmatpush1.bf16.msra.mxu0 %v3529_v34 }
  0x98   :  { %1381 = vmatprep.subr.bf16.mxu0 %v3537_v36 }
  0x9b   :  { %1382 = vmatpush1.bf16.msra.mxu0 %v3535_v38 }
  0x9c   :  { %1687 = vmatprep.subr.bf16.mxu0 %v3543_v40 }
  0xfe   :  { %v239_v50 = vpop.f32.mrf.mxu0  ;;  %v392_v51 = vpop.f32.mrf.mxu1 }
  0xff   :  { %v393_v41 = vadd.f32 %v392_v51, %v239_v50 }
 0x100   :  { %v241_v52 = vpop.f32.mrf.mxu0  ;;  %v394_v53 = vpop.f32.mrf.mxu1 }
 0x101   :  { %v395_v44 = vadd.f32 %v394_v53, %v241_v52  ;;  %v4355_v52 = vrot.slane %v1025_v48, %v4343_v46 }
 0x102   :  { %v243_v54 = vpop.f32.mrf.mxu0  ;;  %v396_v55 = vpop.f32.mrf.mxu1 }
 0x103   :  { %v397_v49 = vadd.f32 %v396_v55, %v243_v54  ;;  %v4359_v54 = vrot.slane %v1025_v48, %v4350_v35 }
 0x104   :  { %v245_v56 = vpop.f32.mrf.mxu0  ;;  %v398_v57 = vpop.f32.mrf.mxu1 }
 0x105   :  { %v399_v51 = vadd.f32 %v398_v57, %v245_v56 }
 0x106   :  { %v4283_v58 = vpop.f32.mrf.mxu0  ;;  %v402_v59 = vpop.f32.mrf.mxu1 }
 0x107   :  { %v403_v53 = vadd.f32 %v402_v59, %v4283_v58 }
 0x108   :  { %v4285_v60 = vpop.f32.mrf.mxu0  ;;  %v4287_v61 = vpop.f32.mrf.mxu1 }
 0x109   :  { %v405_v55 = vadd.f32 %v4287_v61, %v4285_v60 }
 0x10a   :  { %v4289_v62 = vpop.f32.mrf.mxu0  ;;  %v4291_v63 = vpop.f32.mrf.mxu1 }
 0x10b   :  { %v407_v58 = vadd.f32 %v4291_v63, %v4289_v62 }
 0x10c   :  { %v4293_v1 = vpop.f32.mrf.mxu0  ;;  %v4295_v2 = vpop.f32.mrf.mxu1 }
 0x10e   :  { %v4297_v3 = vpop.f32.mrf.mxu0  ;;  %v4299_v4 = vpop.f32.mrf.mxu1 }
 0x10f   :  { %v413_v62 = vadd.f32 %v4299_v4, %v4297_v3 }
 0x110   :  { %v4301_v5 = vpop.f32.mrf.mxu0  ;;  %v4303_v6 = vpop.f32.mrf.mxu1 }
 0x112   :  { %v4305_v7 = vpop.f32.mrf.mxu0  ;;  %v4307_v8 = vpop.f32.mrf.mxu1 }
 0x114   :  { %v4309_v9 = vpop.f32.mrf.mxu0  ;;  %v4311_v10 = vpop.f32.mrf.mxu1 }
 0x116   :  { %v4313_v11 = vpop.f32.mrf.mxu0  ;;  %v4315_v12 = vpop.f32.mrf.mxu1 }
 0x118   :  { %v4317_v13 = vpop.f32.mrf.mxu0  ;;  %v4319_v14 = vpop.f32.mrf.mxu1 }
 0x11a   :  { %v4321_v15 = vpop.f32.mrf.mxu0  ;;  %v4323_v16 = vpop.f32.mrf.mxu1 }
 0x11b   :  { %4537 = vst [vmem:[#allocation15_spill] sm:$0xff] %v4323_v16 }
 0x11c   :  { %v4325_v17 = vpop.f32.mrf.mxu0  ;;  %v4327_v18 = vpop.f32.mrf.mxu1 }
 0x11d   :  { %4538 = vst [vmem:[#allocation16_spill] sm:$0xff] %v4325_v17  ;;  %4539 = vst [vmem:[#allocation17_spill] sm:$0xff] %v4327_v18 }
 0x11e   :  { %v574_v19 = vpop.f32.mrf.mxu0  ;;  %v772_v20 = vpop.f32.mrf.mxu1 }
 0x11f   :  { %v613_v45 = vadd.f32 %v574_v19, %v393_v41 }
 0x120   :  { %v576_v21 = vpop.f32.mrf.mxu0  ;;  %v774_v22 = vpop.f32.mrf.mxu1 }
 0x121   :  { %v614_v0 = vadd.f32 %v576_v21, %v395_v44  ;;  %v811_v17 = vadd.f32 %v772_v20, %v613_v45  ;;  %v409_v44 = vadd.f32 %v4295_v2, %v4293_v1  ;;  %v415_v1 = vadd.f32 %v4303_v6, %v4301_v5 }
 0x122   :  { %v578_v23 = vpop.f32.mrf.mxu0  ;;  %v776_v25 = vpop.f32.mrf.mxu1 }
 0x123   :  { %v812_v41 = vadd.f32 %v774_v22, %v614_v0 }
 0x124   :  { %v580_v24 = vpop.f32.mrf.mxu0  ;;  %v778_v27 = vpop.f32.mrf.mxu1 }
 0x126   :  { %v584_v26 = vpop.f32.mrf.mxu0  ;;  %v782_v30 = vpop.f32.mrf.mxu1 }
 0x127   :  { %v617_v21 = vadd.f32 %v584_v26, %v403_v53 }
 0x128   :  { %v586_v28 = vpop.f32.mrf.mxu0  ;;  %v784_v33 = vpop.f32.mrf.mxu1 }
 0x129   :  { %v618_v59 = vadd.f32 %v586_v28, %v405_v55  ;;  %v815_v60 = vadd.f32 %v782_v30, %v617_v21 }
 0x12a   :  { %v588_v29 = vpop.f32.mrf.mxu0  ;;  %v786_v37 = vpop.f32.mrf.mxu1 }
 0x12b   :  { %v619_v61 = vadd.f32 %v588_v29, %v407_v58  ;;  %v816_v63 = vadd.f32 %v784_v33, %v618_v59 }
 0x12c   :  { %v590_v31 = vpop.f32.mrf.mxu0  ;;  %v4339_v42 = vpop.f32.mrf.mxu1 }
 0x12d   :  { %v620_v28 = vadd.f32 %v590_v31, %v409_v44  ;;  %v817_v2 = vadd.f32 %v786_v37, %v619_v61  ;;  %v417_v31 = vadd.f32 %v4307_v8, %v4305_v7  ;;  %v419_v37 = vadd.f32 %v4311_v10, %v4309_v9 }
 0x12e   :  { %v4329_v32 = vpop.f32.mrf.mxu0  ;;  %v792_v18 = vpop.f32.mrf.mxu1 }
 0x12f   :  { %v621_v29 = vadd.f32 %v4329_v32, %v413_v62  ;;  %v818_v21 = vadd.f32 %v4339_v42, %v620_v28  ;;  %v423_v42 = vadd.f32 %v4315_v12, %v4313_v11 }
 0x130   :  { %v4331_v34 = vpop.f32.mrf.mxu0  ;;  %v794_v39 = vpop.f32.mrf.mxu1 }
 0x131   :  { %v622_v33 = vadd.f32 %v4331_v34, %v415_v1 }
 0x132   :  { %v4333_v36 = vpop.f32.mrf.mxu0  ;;  %v796_v26 = vpop.f32.mrf.mxu1 }
 0x133   :  { %v820_v59 = vadd.f32 %v794_v39, %v622_v33 }
 0x134   :  { %v4335_v38 = vpop.f32.mrf.mxu0  ;;  %v798_v30 = vpop.f32.mrf.mxu1 }
 0x136   :  { %v4337_v40 = vpop.f32.mrf.mxu0 }
 0x138   :  { %v4341_v43 = vpop.f32.mrf.mxu0 }
 0x139   :  { %4540 = vst [vmem:[#allocation18_spill] sm:$0xff] %v4341_v43  ;;  %v615_v43 = vadd.f32 %v578_v23, %v397_v49 }
 0x13a   :  { %v4345_v47 = vpop.f32.mrf.mxu0 }
 0x13b   :  { %4541 = vst [vmem:[#allocation19_spill] sm:$0xff] %v4345_v47  ;;  %v616_v47 = vadd.f32 %v580_v24, %v399_v51  ;;  %v813_v57 = vadd.f32 %v776_v25, %v615_v43 }
 0x13c   :  { %v4352_v50 = vpop.f32.mrf.mxu0 }
 0x13d   :  { %v814_v22 = vadd.f32 %v778_v27, %v616_v47 }
 0x13e   :  { %v970_v19 = vpop.f32.mrf.mxu0 }
 0x13f   :  { %v1009_v16 = vadd.f32 %v970_v19, %v811_v17 }
 0x140   :  { %v972_v56 = vpop.f32.mrf.mxu0 }
 0x141   :  { %v1037_v20 = vadd.f32 %v4355_v52, %v1009_v16  ;;  %v1010_v23 = vadd.f32 %v972_v56, %v812_v41  ;;  %v819_v56 = vadd.f32 %v792_v18, %v621_v29  ;;  %v425_v18 = vadd.f32 %v4319_v14, %v4317_v13 }
 0x142   :  { %v974_v0 = vpop.f32.mrf.mxu0  ;;  %v4546_v28 = vld [vmem:[#allocation19_spill] sm:$0xff] }
 0x143   :  { %v1038_v17 = vadd.f32 %v4359_v54, %v1010_v23  ;;  %v1011_v24 = vadd.f32 %v974_v0, %v813_v57  ;;  %v1053_v25 = vmax.f32 %v1037_v20, 0.0  ;;  %v623_v57 = vadd.f32 %v4333_v36, %v417_v31  ;;  %v802_v20 = vpop.f32.mrf.mxu1 }
 0x144   :  { %v976_v45 = vpop.f32.mrf.mxu0 }
 0x145   :  { %v1054_v43 = vmax.f32 %v1038_v17, 0.0  ;;  %v1039_v16 = vadd.f32 %v4355_v52, %v1011_v24  ;;  %v1012_v48 = vadd.f32 %v976_v45, %v814_v22  ;;  %v624_v22 = vadd.f32 %v4335_v38, %v419_v37  ;;  %v804_v44 = vpop.f32.mrf.mxu1  ;;  %v4542_v38 = vld [vmem:[#allocation15_spill] sm:$0xff] }
 0x146   :  { %v980_v27 = vpop.f32.mrf.mxu0  ;;  %v821_v36 = vadd.f32 %v796_v26, %v623_v57  ;;  %v625_v24 = vadd.f32 %v4337_v40, %v423_v42  ;;  %v427_v39 = vadd.f32 %v4542_v38, %v4321_v15  ;;  %v4544_v40 = vld [vmem:[#allocation16_spill] sm:$0xff]  ;;  %v4545_v26 = vld [vmem:[#allocation17_spill] sm:$0xff] }
 0x147   :  { %v1069_v47 = vmax.f32 %v1053_v25, %v1054_v43  ;;  %v1040_v49 = vadd.f32 %v4359_v54, %v1012_v48  ;;  %v1013_v51 = vadd.f32 %v980_v27, %v815_v60  ;;  %v1055_v19 = vmax.f32 %v1039_v16, 0.0  ;;  %v4543_v25 = vld [vmem:[#allocation18_spill] sm:$0xff] }
 0x148   :  { %v982_v53 = vpop.f32.mrf.mxu0  ;;  %v626_v43 = vadd.f32 %v4543_v25, %v425_v18  ;;  %v822_v48 = vadd.f32 %v798_v30, %v624_v22  ;;  %v823_v27 = vadd.f32 %v802_v20, %v625_v24  ;;  %v3555_v38 = vld [vmem:[#allocation6 + $0x1d4] ss:$8 sps:$4 sm:$0xff]  }
 0x149   :  { %1077 = vst [vmem:[#allocation2] sm:$0xff] %v1069_v47  ;;  %v1056_v41 = vmax.f32 %v1040_v49, 0.0  ;;  %v1041_v3 = vadd.f32 %v4355_v52, %v1013_v51  ;;  %v1014_v4 = vadd.f32 %v982_v53, %v816_v63  ;;  %v429_v63 = vadd.f32 %v4545_v26, %v4544_v40  ;;  %v806_v49 = vpop.f32.mrf.mxu1  ;;  %v3550_v40 = vld [vmem:[#allocation6 + $0x170] ss:$8 sps:$4 sm:$0xff]  }
 0x14a   :  { %v984_v55 = vpop.f32.mrf.mxu0  ;;  %v627_v47 = vadd.f32 %v4546_v28, %v427_v39  ;;  %v3558_v28 = vld [vmem:[#allocation6 + $0x164] ss:$8 sps:$4 sm:$0xff]  }
 0x14b   :  { %v1070_v5 = vmax.f32 %v1055_v19, %v1056_v41  ;;  %v1042_v6 = vadd.f32 %v4359_v54, %v1014_v4  ;;  %v1015_v32 = vadd.f32 %v984_v55, %v817_v2  ;;  %v1057_v58 = vmax.f32 %v1041_v3, 0.0 }
 0x14c   :  { %v986_v23 = vpop.f32.mrf.mxu0  ;;  %v824_v41 = vadd.f32 %v804_v44, %v626_v43  ;;  %v628_v4 = vadd.f32 %v4352_v50, %v429_v63  ;;  %v3549_v44 = vld [vmem:[#allocation6 + $0x1e4] ss:$8 sps:$4 sm:$0xff]   ;;  %v3553_v43 = vld [vmem:[#allocation6 + $0x1d0] ss:$8 sps:$4 sm:$0xff]  }
 0x14d   :  { %1078 = vst [vmem:[#allocation2 + $0x8] sm:$0xff] %v1070_v5  ;;  %v1058_v7 = vmax.f32 %v1042_v6, 0.0  ;;  %v1043_v8 = vadd.f32 %v4355_v52, %v1015_v32  ;;  %v1016_v34 = vadd.f32 %v986_v23, %v818_v21  ;;  %v825_v21 = vadd.f32 %v806_v49, %v627_v47  ;;  %v808_v5 = vpop.f32.mrf.mxu1  ;;  %v3565_v47 = vld [vmem:[#allocation6 + $0x1b0] ss:$8 sps:$4 sm:$0xff]  }
 0x14e   :  { %v990_v0 = vpop.f32.mrf.mxu0  ;;  %v826_v23 = vadd.f32 %v808_v5, %v628_v4  ;;  %v3577_v4 = vld [vmem:[#allocation6 + $0x190] ss:$8 sps:$4 sm:$0xff]  }
 0x14f   :  { %v1071_v17 = vmax.f32 %v1057_v58, %v1058_v7  ;;  %v1044_v9 = vadd.f32 %v4359_v54, %v1016_v34  ;;  %v1017_v10 = vadd.f32 %v990_v0, %v819_v56  ;;  %v1059_v61 = vmax.f32 %v1043_v8, 0.0 }
 0x150   :  { %v992_v60 = vpop.f32.mrf.mxu0 }
 0x151   :  { %1079 = vst [vmem:[#allocation2 + $0x10] sm:$0xff] %v1071_v17  ;;  %v1060_v45 = vmax.f32 %v1044_v9, 0.0  ;;  %v1045_v11 = vadd.f32 %v4355_v52, %v1017_v10  ;;  %v1018_v12 = vadd.f32 %v992_v60, %v820_v59  ;;  %v3541_v10 = vld [vmem:[#allocation6 + $0x1f0] ss:$8 sps:$4 sm:$0xff]  }
 0x152   :  { %v994_v16 = vpop.f32.mrf.mxu0 }
 0x153   :  { %v1072_v62 = vmax.f32 %v1059_v61, %v1060_v45  ;;  %v1046_v13 = vadd.f32 %v4359_v54, %v1018_v12  ;;  %v1019_v14 = vadd.f32 %v994_v16, %v821_v36  ;;  %v1061_v2 = vmax.f32 %v1045_v11, 0.0  ;;  %v3547_v45 = vld [vmem:[#allocation6 + $0x1e0] ss:$8 sps:$4 sm:$0xff]  }
 0x154   :  { %v1085_v51 = vld [vmem:[#allocation2] ss:$2 sm:$0xff]  ;;  %v1093_v1 = vld [vmem:[#allocation2 + $0x1] ss:$2 sm:$0xff]  ;;  %v996_v29 = vpop.f32.mrf.mxu0  ;;  %v4547_v11 = vmov 0  }
 0x155   :  { %v1100_v15 = vmax.f32 %v1085_v51, %v1093_v1  ;;  %1080 = vst [vmem:[#allocation2 + $0x18] sm:$0xff] %v1072_v62  ;;  %v1062_v53 = vmax.f32 %v1046_v13, 0.0  ;;  %v1047_v30 = vadd.f32 %v4355_v52, %v1019_v14  ;;  %v1020_v19 = vadd.f32 %v996_v29, %v822_v48  ;;  %v3559_v16 = vld [vmem:[#allocation6 + $0x1c0] ss:$8 sps:$4 sm:$0xff]   ;;  %v3567_v48 = vld [vmem:[#allocation6 + $0x1b4] ss:$8 sps:$4 sm:$0xff]  }
 0x156   :  { %v1000_v3 = vpop.f32.mrf.mxu0  ;;  %v3573_v51 = vld [vmem:[#allocation6 + $0x1a4] ss:$8 sps:$4 sm:$0xff]   ;;  %v3556_v1 = vld [vmem:[#allocation6 + $0x160] ss:$8 sps:$4 sm:$0xff]  }
 0x157   :  { %1104 = vst [vmem:[#allocation3] sm:$0xff] %v1100_v15  ;;  %v1073_v31 = vmax.f32 %v1061_v2, %v1062_v53  ;;  %v1048_v33 = vadd.f32 %v4359_v54, %v1020_v19  ;;  %v1021_v55 = vadd.f32 %v1000_v3, %v823_v27  ;;  %v1063_v32 = vmax.f32 %v1047_v30, 0.0  ;;  %v3564_v2 = vld [vmem:[#allocation6 + $0x154] ss:$8 sps:$4 sm:$0xff]   ;;  %v3571_v29 = vld [vmem:[#allocation6 + $0x1a0] ss:$8 sps:$4 sm:$0xff]  }
 0x158   :  { %v1002_v6 = vpop.f32.mrf.mxu0  ;;  %v3562_v53 = vld [vmem:[#allocation6 + $0x150] ss:$8 sps:$4 sm:$0xff]   ;;  %v3570_v3 = vld [vmem:[#allocation6 + $0x144] ss:$8 sps:$4 sm:$0xff]  }
 0x159   :  { %1081 = vst [vmem:[#allocation2 + $0x20] sm:$0xff] %v1073_v31  ;;  %v1064_v37 = vmax.f32 %v1048_v33, 0.0  ;;  %v1049_v56 = vadd.f32 %v4355_v52, %v1021_v55  ;;  %v1022_v57 = vadd.f32 %v1002_v6, %v824_v41  ;;  %v3585_v31 = vld [vmem:[#allocation6 + $0x184] ss:$8 sps:$4 sm:$0xff]   ;;  %v3568_v33 = vld [vmem:[#allocation6 + $0x140] ss:$8 sps:$4 sm:$0xff]  }
 0x15a   :  { %v1004_v20 = vpop.f32.mrf.mxu0  ;;  %v3576_v55 = vld [vmem:[#allocation6 + $0x134] ss:$8 sps:$4 sm:$0xff]   ;;  %v3574_v6 = vld [vmem:[#allocation6 + $0x130] ss:$8 sps:$4 sm:$0xff]  }
 0x15b   :  { %v1074_v58 = vmax.f32 %v1063_v32, %v1064_v37  ;;  %v1050_v7 = vadd.f32 %v4359_v54, %v1022_v57  ;;  %v1023_v50 = vadd.f32 %v1004_v20, %v825_v21  ;;  %v1065_v42 = vmax.f32 %v1049_v56, 0.0  ;;  %v3583_v21 = vld [vmem:[#allocation6 + $0x180] ss:$8 sps:$4 sm:$0xff]   ;;  %v3582_v32 = vld [vmem:[#allocation6 + $0x124] ss:$8 sps:$4 sm:$0xff]  }
 0x15c   :  { %v1087_v8 = vld [vmem:[#allocation2 + $0x10] ss:$2 sm:$0xff]  ;;  %v1095_v34 = vld [vmem:[#allocation2 + $0x11] ss:$2 sm:$0xff]  ;;  %v1006_v59 = vpop.f32.mrf.mxu0 }
 0x15d   :  { %v1101_v0 = vmax.f32 %v1087_v8, %v1095_v34  ;;  %1082 = vst [vmem:[#allocation2 + $0x28] sm:$0xff] %v1074_v58  ;;  %v1066_v22 = vmax.f32 %v1050_v7, 0.0  ;;  %v1051_v17 = vadd.f32 %v4355_v52, %v1023_v50  ;;  %v1024_v9 = vadd.f32 %v1006_v59, %v826_v23  ;;  %v3580_v57 = vld [vmem:[#allocation6 + $0x120] ss:$8 sps:$4 sm:$0xff]   ;;  %v3588_v20 = vld [vmem:[#allocation6 + $0x114] ss:$8 sps:$4 sm:$0xff]  }
 0x15e   :  { %v3586_v7 = vld [vmem:[#allocation6 + $0x110] ss:$8 sps:$4 sm:$0xff]   ;;  %v3591_v50 = vld [vmem:[#allocation6 + $0x104] ss:$8 sps:$4 sm:$0xff]   ;;  %v3589_v34 = vld [vmem:[#allocation6 + $0x100] ss:$8 sps:$4 sm:$0xff]  }
 0x15f   :  { %1105 = vst [vmem:[#allocation3 + $0x8] sm:$0xff] %v1101_v0  ;;  %v1075_v18 = vmax.f32 %v1065_v42, %v1066_v22  ;;  %v1052_v36 = vadd.f32 %v4359_v54, %v1024_v9  ;;  %v1113_v24 = vpack.c.bf16 %v1101_v0, %v1100_v15  ;;  %v1067_v60 = vmax.f32 %v1051_v17, 0.0  ;;  %v3561_v54 = vld [vmem:[#allocation6 + $0x1c4] ss:$8 sps:$4 sm:$0xff]   ;;  %v3579_v15 = vld [vmem:[#allocation6 + $0x194] ss:$8 sps:$4 sm:$0xff]  }
 0x160   :  { %v3594_v42 = vld [vmem:[#allocation6 + $0x274] ss:$8 sps:$4 sm:$0xff]   ;;  %v3592_v22 = vld [vmem:[#allocation6 + $0x270] ss:$8 sps:$4 sm:$0xff]   ;;  %v3597_v9 = vld [vmem:[#allocation6 + $0x264] ss:$8 sps:$4 sm:$0xff]  }
 0x161   :  { %1083 = vst [vmem:[#allocation2 + $0x30] sm:$0xff] %v1075_v18  ;;  %v1068_v61 = vmax.f32 %v1052_v36, 0.0  ;;  %1400 = vmatmul.mubr.bf16.vlgmr.msra.gmra.mxu0 %v1113_v24  ;;  %v3600_v18 = vld [vmem:[#allocation6 + $0x254] ss:$8 sps:$4 sm:$0xff]  }
 0x162   :  { %1688 = vmatpush1.bf16.msra.mxu0 %v3541_v10  ;;  %1409 = vmatprep.mubr.bf16.mxu0 %v4547_v11  ;;  %v3595_v10 = vld [vmem:[#allocation6 + $0x260] ss:$8 sps:$4 sm:$0xff]  }
 0x163   :  { %v1076_v12 = vmax.f32 %v1067_v60, %v1068_v61  ;;  %1689 = vmatprep.subr.bf16.mxu0 %v3549_v44  ;;  %v3598_v44 = vld [vmem:[#allocation6 + $0x250] ss:$8 sps:$4 sm:$0xff]   ;;  %v3603_v61 = vld [vmem:[#allocation6 + $0x244] ss:$8 sps:$4 sm:$0xff]  }
 0x164   :  { %v1089_v52 = vld [vmem:[#allocation2 + $0x20] ss:$2 sm:$0xff]  ;;  %v1097_v39 = vld [vmem:[#allocation2 + $0x21] ss:$2 sm:$0xff] }
 0x165   :  { %v1102_v25 = vmax.f32 %v1089_v52, %v1097_v39  ;;  %1084 = vst [vmem:[#allocation2 + $0x38] sm:$0xff] %v1076_v12  ;;  %v3606_v12 = vld [vmem:[#allocation6 + $0x234] ss:$8 sps:$4 sm:$0xff]   ;;  %v3609_v52 = vld [vmem:[#allocation6 + $0x224] ss:$8 sps:$4 sm:$0xff]  }
 0x166   :  { %1690 = vmatpush1.bf16.msra.mxu0 %v3547_v45  ;;  %v1131_v26 = vld [vmem:[#allocation3 + $0x1] sm:$0xff] }
 0x167   :  { %1106 = vst [vmem:[#allocation3 + $0x10] sm:$0xff] %v1102_v25  ;;  %1691 = vmatprep.subr.bf16.mxu0 %v3555_v38  ;;  %v1584_v37 = vld [vmem:[#allocation3 + $0x3] sm:$0xff] }
 0x168   :  { %v1420_v0 = vld [vmem:[#allocation3 + $0x2] sm:$0xff] }
 0x169   :  { %v3601_v45 = vld [vmem:[#allocation6 + $0x240] ss:$8 sps:$4 sm:$0xff]   ;;  %v3604_v38 = vld [vmem:[#allocation6 + $0x230] ss:$8 sps:$4 sm:$0xff]  }
 0x16a   :  { %1692 = vmatpush1.bf16.msra.mxu0 %v3553_v43  ;;  %v3607_v39 = vld [vmem:[#allocation6 + $0x220] ss:$8 sps:$4 sm:$0xff]   ;;  %v3610_v43 = vld [vmem:[#allocation6 + $0x210] ss:$8 sps:$4 sm:$0xff]  }
 0x16b   :  { %1693 = vmatprep.subr.bf16.mxu0 %v3561_v54  ;;  %v3615_v54 = vld [vmem:[#allocation6 + $0x204] ss:$8 sps:$4 sm:$0xff]  }
 0x16c   :  { %v1091_v62 = vld [vmem:[#allocation2 + $0x30] ss:$2 sm:$0xff]  ;;  %v1099_v13 = vld [vmem:[#allocation2 + $0x31] ss:$2 sm:$0xff] }
 0x16d   :  { %v1103_v14 = vmax.f32 %v1091_v62, %v1099_v13  ;;  %v1748_v62 = vld [vmem:[#allocation3 + $0x4] sm:$0xff] }
 0x16e   :  { %v1132_v63 = vld [vmem:[#allocation3 + $0x9] sm:$0xff]  ;;  %1694 = vmatpush1.bf16.msra.mxu0 %v3559_v16  ;;  %v3613_v16 = vld [vmem:[#allocation6 + $0x200] ss:$8 sps:$4 sm:$0xff]  }
 0x16f   :  { %v1135_v27 = vpack.c.bf16 %v1132_v63, %v1131_v26  ;;  %1695 = vmatprep.subr.bf16.mxu0 %v3567_v48  ;;  %1107 = vst [vmem:[#allocation3 + $0x18] sm:$0xff] %v1103_v14  ;;  %v1114_v49 = vpack.c.bf16 %v1103_v14, %v1102_v25  ;;  %v1585_v5 = vld [vmem:[#allocation3 + $0xb] sm:$0xff] }
 0x170   :  { %v1588_v56 = vpack.c.bf16 %v1585_v5, %v1584_v37  ;;  %v1421_v59 = vld [vmem:[#allocation3 + $0xa] sm:$0xff]  ;;  %v3648_v5 = vld [vmem:[#allocation9 + $0xa4] ss:$8 sps:$4 sm:$0xff]   ;;  %v3649_v37 = vld [vmem:[#allocation9 + $0x20] ss:$8 sps:$4 sm:$0xff]  }
 0x171   :  { %1267 = vmatmul.mubr.bf16.vlgmr.msra.gmra.mxu1 %v1135_v27  ;;  %1410 = vmatmul.mubr.bf16.gmra.mxu0 %v1114_v49  ;;  %v1424_v17 = vpack.c.bf16 %v1421_v59, %v1420_v0  ;;  %v3612_v25 = vld [vmem:[#allocation6 + $0x214] ss:$8 sps:$4 sm:$0xff]   ;;  %v3624_v49 = vld [vmem:[#allocation9 + $0xe4] ss:$8 sps:$4 sm:$0xff]  }
 0x172   :  { %1524 = vmatpush1.bf16.msra.mxu1 %v3550_v40  ;;  %1276 = vmatprep.mubr.bf16.mxu1 %v4547_v11  ;;  %v1749_v48 = vld [vmem:[#allocation3 + $0xc] sm:$0xff] }
 0x173   :  { %1525 = vmatprep.subr.bf16.mxu1 %v3558_v28  ;;  %1696 = vmatpush1.bf16.msra.mxu0 %v3565_v47  ;;  %v1752_v13 = vpack.c.bf16 %v1749_v48, %v1748_v62  ;;  %v3618_v63 = vld [vmem:[#allocation9 + $0xf4] ss:$8 sps:$4 sm:$0xff]   ;;  %v3616_v28 = vld [vmem:[#allocation9 + $0xf0] ss:$8 sps:$4 sm:$0xff]  }
 0x174   :  { %1697 = vmatprep.subr.bf16.mxu0 %v3573_v51  ;;  %1719 = vmatprep.mubr.bf16.mxu0 %v4547_v11  ;;  %v3621_v27 = vld [vmem:[#allocation9 + $0x74] ss:$8 sps:$4 sm:$0xff]   ;;  %v3619_v47 = vld [vmem:[#allocation9 + $0x70] ss:$8 sps:$4 sm:$0xff]   ;;  %v3627_v51 = vld [vmem:[#allocation9 + $0x64] ss:$8 sps:$4 sm:$0xff]  }
 0x176   :  { %1526 = vmatpush1.bf16.msra.mxu1 %v3556_v1  ;;  %v1133_v30 = vld [vmem:[#allocation3 + $0x11] sm:$0xff]  ;;  %v1134_v19 = vld [vmem:[#allocation3 + $0x19] sm:$0xff] }
 0x177   :  { %1527 = vmatprep.subr.bf16.mxu1 %v3564_v2  ;;  %v1136_v41 = vpack.c.bf16 %v1134_v19, %v1133_v30  ;;  %1698 = vmatpush1.bf16.msra.mxu0 %v3571_v29  ;;  %v1586_v23 = vld [vmem:[#allocation3 + $0x13] sm:$0xff]  ;;  %v1587_v58 = vld [vmem:[#allocation3 + $0x1b] sm:$0xff] }
 0x178   :  { %1699 = vmatprep.subr.bf16.mxu0 %v3579_v15  ;;  %v1589_v8 = vpack.c.bf16 %v1587_v58, %v1586_v23  ;;  %v1422_v36 = vld [vmem:[#allocation3 + $0x12] sm:$0xff]  ;;  %v1423_v24 = vld [vmem:[#allocation3 + $0x1a] sm:$0xff] }
 0x179   :  { %1277 = vmatmul.mubr.bf16.gmra.mxu1 %v1136_v41  ;;  %v1425_v60 = vpack.c.bf16 %v1423_v24, %v1422_v36  ;;  %v1750_v14 = vld [vmem:[#allocation3 + $0x14] sm:$0xff]  ;;  %v1751_v40 = vld [vmem:[#allocation3 + $0x1c] sm:$0xff]  ;;  %v3631_v30 = vld [vmem:[#allocation9 + $0x50] ss:$8 sps:$4 sm:$0xff]  }
 0x17a   :  { %1528 = vmatpush1.bf16.msra.mxu1 %v3562_v53  ;;  %1555 = vmatprep.mubr.bf16.mxu1 %v4547_v11  ;;  %v1753_v26 = vpack.c.bf16 %v1751_v40, %v1750_v14  ;;  %v3622_v1 = vld [vmem:[#allocation9 + $0xe0] ss:$8 sps:$4 sm:$0xff]   ;;  %v3630_v29 = vld [vmem:[#allocation9 + $0xd4] ss:$8 sps:$4 sm:$0xff]   ;;  %v3628_v53 = vld [vmem:[#allocation9 + $0xd0] ss:$8 sps:$4 sm:$0xff]  }
 0x17b   :  { %1529 = vmatprep.subr.bf16.mxu1 %v3570_v3  ;;  %1700 = vmatpush1.bf16.msra.mxu0 %v3577_v4  ;;  %v3625_v2 = vld [vmem:[#allocation9 + $0x60] ss:$8 sps:$4 sm:$0xff]   ;;  %v3633_v15 = vld [vmem:[#allocation9 + $0x54] ss:$8 sps:$4 sm:$0xff]   ;;  %v3636_v19 = vld [vmem:[#allocation9 + $0xc4] ss:$8 sps:$4 sm:$0xff]  }
 0x17c   :  { %1701 = vmatprep.subr.bf16.mxu0 %v3585_v31  ;;  %v3639_v41 = vld [vmem:[#allocation9 + $0x44] ss:$8 sps:$4 sm:$0xff]   ;;  %v3634_v3 = vld [vmem:[#allocation9 + $0xc0] ss:$8 sps:$4 sm:$0xff]   ;;  %v3642_v31 = vld [vmem:[#allocation9 + $0xb4] ss:$8 sps:$4 sm:$0xff]  }
 0x17d   :  { %v3637_v4 = vld [vmem:[#allocation9 + $0x40] ss:$8 sps:$4 sm:$0xff]   ;;  %v3657_v23 = vld [vmem:[#allocation9 + $0x14] ss:$8 sps:$4 sm:$0xff]   ;;  %v3660_v58 = vld [vmem:[#allocation9 + $0x84] ss:$8 sps:$4 sm:$0xff]  }
 0x17e   :  { %1530 = vmatpush1.bf16.msra.mxu1 %v3568_v33  ;;  %v3645_v33 = vld [vmem:[#allocation9 + $0x34] ss:$8 sps:$4 sm:$0xff]  }
 0x17f   :  { %1531 = vmatprep.subr.bf16.mxu1 %v3576_v55  ;;  %1702 = vmatpush1.bf16.msra.mxu0 %v3583_v21  ;;  %v3640_v55 = vld [vmem:[#allocation9 + $0xb0] ss:$8 sps:$4 sm:$0xff]  }
 0x180   :  { %2076 = vmatprep.subr.bf16.mxu0 %v3618_v63  ;;  %v3643_v21 = vld [vmem:[#allocation9 + $0x30] ss:$8 sps:$4 sm:$0xff]  }
 0x182   :  { %1532 = vmatpush1.bf16.msra.mxu1 %v3574_v6  ;;  %1720 = vmatmul.mubr.bf16.vlgmr.msra.gmra.mxu0 %v1588_v56  ;;  %v3651_v6 = vld [vmem:[#allocation9 + $0x24] ss:$8 sps:$4 sm:$0xff]   ;;  %v3652_v56 = vld [vmem:[#allocation9 + $0x90] ss:$8 sps:$4 sm:$0xff]  }
 0x183   :  { %1533 = vmatprep.subr.bf16.mxu1 %v3582_v32  ;;  %1729 = vmatprep.mubr.bf16.mxu0 %v4547_v11  ;;  %v3646_v32 = vld [vmem:[#allocation9 + $0xa0] ss:$8 sps:$4 sm:$0xff]  }
 0x184   :  { %2077 = vmatpush1.bf16.msra.mxu0 %v3616_v28 }
 0x185   :  { %2078 = vmatprep.subr.bf16.mxu0 %v3624_v49 }
 0x186   :  { %1534 = vmatpush1.bf16.msra.mxu1 %v3580_v57  ;;  %v3654_v57 = vld [vmem:[#allocation9 + $0x94] ss:$8 sps:$4 sm:$0xff]  }
 0x187   :  { %1535 = vmatprep.subr.bf16.mxu1 %v3588_v20  ;;  %v3655_v20 = vld [vmem:[#allocation9 + $0x10] ss:$8 sps:$4 sm:$0xff]  }
 0x188   :  { %2079 = vmatpush1.bf16.msra.mxu0 %v3622_v1 }
 0x189   :  { %2080 = vmatprep.subr.bf16.mxu0 %v3630_v29 }
 0x18a   :  { %1536 = vmatpush1.bf16.msra.mxu1 %v3586_v7  ;;  %1730 = vmatmul.mubr.bf16.gmra.mxu0 %v1589_v8  ;;  %v3663_v7 = vld [vmem:[#allocation9 + $0x4] ss:$8 sps:$4 sm:$0xff]   ;;  %v3661_v8 = vld [vmem:[#allocation9] ss:$8 sps:$4 sm:$0xff]  }
 0x18b   :  { %1537 = vmatprep.subr.bf16.mxu1 %v3591_v50  ;;  %2108 = vmatprep.mubr.bf16.mxu0 %v4547_v11  ;;  %v3658_v50 = vld [vmem:[#allocation9 + $0x80] ss:$8 sps:$4 sm:$0xff]  }
 0x18c   :  { %2081 = vmatpush1.bf16.msra.mxu0 %v3628_v53 }
 0x18d   :  { %2082 = vmatprep.subr.bf16.mxu0 %v3636_v19 }
 0x18e   :  { %1538 = vmatpush1.bf16.msra.mxu1 %v3589_v34  ;;  %v3666_v34 = vld [vmem:[#allocation9 + $0x174] ss:$8 sps:$4 sm:$0xff]  }
 0x18f   :  { %1851 = vmatprep.subr.bf16.mxu1 %v3594_v42  ;;  %v3669_v42 = vld [vmem:[#allocation9 + $0x1f4] ss:$8 sps:$4 sm:$0xff]  }
 0x190   :  { %2083 = vmatpush1.bf16.msra.mxu0 %v3634_v3 }
 0x191   :  { %1556 = vmatmul.mubr.bf16.vlgmr.msra.gmra.mxu1 %v1424_v17  ;;  %2084 = vmatprep.subr.bf16.mxu0 %v3642_v31 }
 0x192   :  { %1852 = vmatpush1.bf16.msra.mxu1 %v3592_v22  ;;  %1565 = vmatprep.mubr.bf16.mxu1 %v4547_v11 }
 0x193   :  { %1853 = vmatprep.subr.bf16.mxu1 %v3597_v9 }
 0x194   :  { %2085 = vmatpush1.bf16.msra.mxu0 %v3640_v55 }
 0x195   :  { %2086 = vmatprep.subr.bf16.mxu0 %v3648_v5 }
 0x196   :  { %1854 = vmatpush1.bf16.msra.mxu1 %v3595_v10 }
 0x197   :  { %1855 = vmatprep.subr.bf16.mxu1 %v3600_v18 }
 0x198   :  { %2087 = vmatpush1.bf16.msra.mxu0 %v3646_v32 }
 0x199   :  { %1566 = vmatmul.mubr.bf16.gmra.mxu1 %v1425_v60  ;;  %2088 = vmatprep.subr.bf16.mxu0 %v3654_v57 }
 0x19a   :  { %1856 = vmatpush1.bf16.msra.mxu1 %v3598_v44  ;;  %1883 = vmatprep.mubr.bf16.mxu1 %v4547_v11 }
 0x19b   :  { %1857 = vmatprep.subr.bf16.mxu1 %v3603_v61 }
 0x19c   :  { %2089 = vmatpush1.bf16.msra.mxu0 %v3652_v56 }
 0x19d   :  { %2090 = vmatprep.subr.bf16.mxu0 %v3660_v58 }
 0x19e   :  { %1858 = vmatpush1.bf16.msra.mxu1 %v3601_v45 }
 0x19f   :  { %1859 = vmatprep.subr.bf16.mxu1 %v3606_v12 }
 0x1a0   :  { %2091 = vmatpush1.bf16.msra.mxu0 %v3658_v50 }
 0x1a1   :  { %2337 = vmatprep.subr.bf16.mxu0 %v3666_v34 }
 0x1a2   :  { %1860 = vmatpush1.bf16.msra.mxu1 %v3604_v38 }
 0x1a3   :  { %1861 = vmatprep.subr.bf16.mxu1 %v3609_v52 }
 0x1a6   :  { %1862 = vmatpush1.bf16.msra.mxu1 %v3607_v39 }
 0x1a7   :  { %1863 = vmatprep.subr.bf16.mxu1 %v3612_v25 }
 0x1aa   :  { %1864 = vmatpush1.bf16.msra.mxu1 %v3610_v43 }
 0x1ab   :  { %1865 = vmatprep.subr.bf16.mxu1 %v3615_v54 }
 0x1ae   :  { %1866 = vmatpush1.bf16.msra.mxu1 %v3613_v16 }
 0x1af   :  { %2197 = vmatprep.subr.bf16.mxu1 %v3621_v27 }
 0x1b1   :  { %1884 = vmatmul.mubr.bf16.vlgmr.msra.gmra.mxu1 %v1752_v13 }
 0x1b2   :  { %1893 = vmatprep.mubr.bf16.mxu1 %v4547_v11  ;;  %2198 = vmatpush1.bf16.msra.mxu1 %v3619_v47  ;;  %v1912_v47 = vld [vmem:[%s4527_s4] sm:$0x3] }
 0x1b3   :  { %2199 = vmatprep.subr.bf16.mxu1 %v3627_v51  ;;  %v1917_v53 = vrot.slane %v1912_v47, %v4343_v46 }
 0x1b6   :  { %2200 = vmatpush1.bf16.msra.mxu1 %v3625_v2 }
 0x1b7   :  { %2201 = vmatprep.subr.bf16.mxu1 %v3633_v15 }
 0x1b9   :  { %1894 = vmatmul.mubr.bf16.gmra.mxu1 %v1753_v26 }
 0x1ba   :  { %2229 = vmatprep.mubr.bf16.mxu1 %v4547_v11  ;;  %2202 = vmatpush1.bf16.msra.mxu1 %v3631_v30 }
 0x1bb   :  { %2203 = vmatprep.subr.bf16.mxu1 %v3639_v41 }
 0x1be   :  { %2204 = vmatpush1.bf16.msra.mxu1 %v3637_v4 }
 0x1bf   :  { %2205 = vmatprep.subr.bf16.mxu1 %v3645_v33  ;;  %v1921_v33 = vrot.slane %v1912_v47, %v4350_v35 }
 0x1c2   :  { %2206 = vmatpush1.bf16.msra.mxu1 %v3643_v21 }
 0x1c3   :  { %2207 = vmatprep.subr.bf16.mxu1 %v3651_v6 }
 0x1c6   :  { %2208 = vmatpush1.bf16.msra.mxu1 %v3649_v37 }
 0x1c7   :  { %2209 = vmatprep.subr.bf16.mxu1 %v3657_v23 }
 0x1ca   :  { %2210 = vmatpush1.bf16.msra.mxu1 %v3655_v20 }
 0x1cb   :  { %2211 = vmatprep.subr.bf16.mxu1 %v3663_v7 }
 0x1ce   :  { %2212 = vmatpush1.bf16.msra.mxu1 %v3661_v8 }
 0x1cf   :  { %2479 = vmatprep.subr.bf16.mxu1 %v3669_v42 }
 0x221   :  { %v1401_v9 = vpop.f32.mrf.mxu0 }
 0x223   :  { %v1403_v18 = vpop.f32.mrf.mxu0 }
 0x225   :  { %v1405_v24 = vpop.f32.mrf.mxu0 }
 0x227   :  { %v1407_v60 = vpop.f32.mrf.mxu0 }
 0x231   :  { %v1268_v59 = vpop.f32.mrf.mxu1  ;;  %v1411_v45 = vpop.f32.mrf.mxu0 }
 0x232   :  { %v1402_v40 = vadd.f32 %v1401_v9, %v1268_v59 }
 0x233   :  { %v1270_v0 = vpop.f32.mrf.mxu1  ;;  %v1413_v38 = vpop.f32.mrf.mxu0 }
 0x234   :  { %v1404_v63 = vadd.f32 %v1403_v18, %v1270_v0 }
 0x235   :  { %v1272_v22 = vpop.f32.mrf.mxu1  ;;  %v1415_v39 = vpop.f32.mrf.mxu0 }
 0x236   :  { %v1406_v49 = vadd.f32 %v1405_v24, %v1272_v22 }
 0x237   :  { %v1274_v17 = vpop.f32.mrf.mxu1  ;;  %v1417_v43 = vpop.f32.mrf.mxu0 }
 0x238   :  { %v1408_v2 = vadd.f32 %v1407_v60, %v1274_v17 }
 0x239   :  { %v1278_v10 = vpop.f32.mrf.mxu1 }
 0x23a   :  { %v1412_v30 = vadd.f32 %v1411_v45, %v1278_v10 }
 0x23b   :  { %v1280_v36 = vpop.f32.mrf.mxu1 }
 0x23c   :  { %v1414_v55 = vadd.f32 %v1413_v38, %v1280_v36 }
 0x23d   :  { %v1282_v44 = vpop.f32.mrf.mxu1 }
 0x23e   :  { %v1416_v56 = vadd.f32 %v1415_v39, %v1282_v44 }
 0x23f   :  { %v1284_v61 = vpop.f32.mrf.mxu1 }
 0x240   :  { %v1418_v8 = vadd.f32 %v1417_v43, %v1284_v61 }
 0x242   :  { %v1721_v16 = vpop.f32.mrf.mxu0 }
 0x244   :  { %v1723_v62 = vpop.f32.mrf.mxu0 }
 0x246   :  { %v1725_v14 = vpop.f32.mrf.mxu0 }
 0x248   :  { %v1727_v28 = vpop.f32.mrf.mxu0 }
 0x24a   :  { %v1731_v19 = vpop.f32.mrf.mxu0 }
 0x24c   :  { %v1733_v57 = vpop.f32.mrf.mxu0 }
 0x24e   :  { %v1735_v10 = vpop.f32.mrf.mxu0 }
 0x250   :  { %v1737_v43 = vpop.f32.mrf.mxu0 }
 0x251   :  { %v1557_v12 = vpop.f32.mrf.mxu1 }
 0x252   :  { %v1576_v27 = vadd.f32 %v1557_v12, %v1402_v40 }
 0x253   :  { %v1559_v52 = vpop.f32.mrf.mxu1 }
 0x254   :  { %v1577_v51 = vadd.f32 %v1559_v52, %v1404_v63  ;;  %v1740_v15 = vadd.f32 %v1721_v16, %v1576_v27 }
 0x255   :  { %v1561_v25 = vpop.f32.mrf.mxu1 }
 0x256   :  { %v1578_v29 = vadd.f32 %v1561_v25, %v1406_v49  ;;  %v1741_v31 = vadd.f32 %v1723_v62, %v1577_v51 }
 0x257   :  { %v1563_v54 = vpop.f32.mrf.mxu1 }
 0x258   :  { %v1579_v3 = vadd.f32 %v1563_v54, %v1408_v2  ;;  %v1742_v37 = vadd.f32 %v1725_v14, %v1578_v29 }
 0x259   :  { %v1567_v48 = vpop.f32.mrf.mxu1 }
 0x25a   :  { %v1580_v21 = vadd.f32 %v1567_v48, %v1412_v30  ;;  %v1743_v50 = vadd.f32 %v1727_v28, %v1579_v3  ;;  %v3664_v3 = vld [vmem:[#allocation9 + $0x170] ss:$8 sps:$4 sm:$0xff]  }
 0x25b   :  { %v1569_v13 = vpop.f32.mrf.mxu1 }
 0x25c   :  { %v1581_v20 = vadd.f32 %v1569_v13, %v1414_v55  ;;  %v1744_v59 = vadd.f32 %v1731_v19, %v1580_v21 }
 0x25d   :  { %v1571_v26 = vpop.f32.mrf.mxu1 }
 0x25e   :  { %v1582_v34 = vadd.f32 %v1571_v26, %v1416_v56  ;;  %v1745_v36 = vadd.f32 %v1733_v57, %v1581_v20  ;;  %v3681_v56 = vld [vmem:[#allocation9 + $0x1d4] ss:$8 sps:$4 sm:$0xff]   ;;  %v3676_v57 = vld [vmem:[#allocation9 + $0x150] ss:$8 sps:$4 sm:$0xff]  }
 0x25f   :  { %v1573_v1 = vpop.f32.mrf.mxu1  ;;  %v3679_v20 = vld [vmem:[#allocation9 + $0x1d0] ss:$8 sps:$4 sm:$0xff]  }
 0x260   :  { %v1583_v24 = vadd.f32 %v1573_v1, %v1418_v8  ;;  %v1746_v38 = vadd.f32 %v1735_v10, %v1582_v34  ;;  %v3690_v8 = vld [vmem:[#allocation9 + $0x134] ss:$8 sps:$4 sm:$0xff]  }
 0x261   :  { %v3693_v34 = vld [vmem:[#allocation9 + $0x1b4] ss:$8 sps:$4 sm:$0xff]  }
 0x262   :  { %v1747_v13 = vadd.f32 %v1737_v43, %v1583_v24  ;;  %v3702_v10 = vld [vmem:[#allocation9 + $0x114] ss:$8 sps:$4 sm:$0xff]   ;;  %v3703_v24 = vld [vmem:[#allocation9 + $0x190] ss:$8 sps:$4 sm:$0xff]  }
 0x271   :  { %v1885_v41 = vpop.f32.mrf.mxu1 }
 0x272   :  { %v1904_v4 = vadd.f32 %v1885_v41, %v1740_v15 }
 0x273   :  { %v1887_v5 = vpop.f32.mrf.mxu1 }
 0x274   :  { %v1924_v6 = vadd.f32 %v1917_v53, %v1904_v4  ;;  %v1905_v32 = vadd.f32 %v1887_v5, %v1741_v31  ;;  %v3667_v4 = vld [vmem:[#allocation9 + $0x1f0] ss:$8 sps:$4 sm:$0xff]   ;;  %v3675_v5 = vld [vmem:[#allocation9 + $0x1e4] ss:$8 sps:$4 sm:$0xff]  }
 0x275   :  { %v1889_v23 = vpop.f32.mrf.mxu1 }
 0x276   :  { %v1925_v58 = vadd.f32 %v1921_v33, %v1905_v32  ;;  %v1906_v7 = vadd.f32 %v1889_v23, %v1742_v37  ;;  %v1932_v0 = vmax.f32 %v1924_v6, 0.0  ;;  %v3670_v6 = vld [vmem:[#allocation9 + $0x160] ss:$8 sps:$4 sm:$0xff]   ;;  %v3678_v37 = vld [vmem:[#allocation9 + $0x154] ss:$8 sps:$4 sm:$0xff]  }
 0x277   :  { %v1891_v42 = vpop.f32.mrf.mxu1  ;;  %v3673_v32 = vld [vmem:[#allocation9 + $0x1e0] ss:$8 sps:$4 sm:$0xff]   ;;  %v3684_v23 = vld [vmem:[#allocation9 + $0x144] ss:$8 sps:$4 sm:$0xff]  }
 0x278   :  { %v1933_v22 = vmax.f32 %v1925_v58, 0.0  ;;  %v1926_v17 = vadd.f32 %v1917_v53, %v1906_v7  ;;  %v1907_v9 = vadd.f32 %v1891_v42, %v1743_v50  ;;  %v3687_v58 = vld [vmem:[#allocation9 + $0x1c4] ss:$8 sps:$4 sm:$0xff]   ;;  %v3682_v7 = vld [vmem:[#allocation9 + $0x140] ss:$8 sps:$4 sm:$0xff]  }
 0x279   :  { %v1895_v18 = vpop.f32.mrf.mxu1  ;;  %v3685_v50 = vld [vmem:[#allocation9 + $0x1c0] ss:$8 sps:$4 sm:$0xff]   ;;  %v3688_v42 = vld [vmem:[#allocation9 + $0x130] ss:$8 sps:$4 sm:$0xff]  }
 0x27a   :  { %v1940_v60 = vmax.f32 %v1932_v0, %v1933_v22  ;;  %v1927_v44 = vadd.f32 %v1921_v33, %v1907_v9  ;;  %v1908_v45 = vadd.f32 %v1895_v18, %v1744_v59  ;;  %v1934_v52 = vmax.f32 %v1926_v17, 0.0  ;;  %v3691_v59 = vld [vmem:[#allocation9 + $0x1b0] ss:$8 sps:$4 sm:$0xff]   ;;  %v3696_v0 = vld [vmem:[#allocation9 + $0x124] ss:$8 sps:$4 sm:$0xff]  }
 0x27b   :  { %v1897_v12 = vpop.f32.mrf.mxu1  ;;  %v3699_v22 = vld [vmem:[#allocation9 + $0x1a4] ss:$8 sps:$4 sm:$0xff]   ;;  %v3694_v17 = vld [vmem:[#allocation9 + $0x120] ss:$8 sps:$4 sm:$0xff]   ;;  %v3705_v18 = vld [vmem:[#allocation9 + $0x194] ss:$8 sps:$4 sm:$0xff]  }
 0x27c   :  { %1944 = vst [vmem:[#allocation4] sm:$0xff] %v1940_v60  ;;  %v1935_v39 = vmax.f32 %v1927_v44, 0.0  ;;  %v1928_v61 = vadd.f32 %v1917_v53, %v1908_v45  ;;  %v1909_v25 = vadd.f32 %v1897_v12, %v1745_v36  ;;  %v3697_v9 = vld [vmem:[#allocation9 + $0x1a0] ss:$8 sps:$4 sm:$0xff]   ;;  %v3700_v36 = vld [vmem:[#allocation9 + $0x110] ss:$8 sps:$4 sm:$0xff]  }
 0x27d   :  { %v1899_v54 = vpop.f32.mrf.mxu1  ;;  %v3708_v60 = vld [vmem:[#allocation9 + $0x104] ss:$8 sps:$4 sm:$0xff]   ;;  %v3706_v45 = vld [vmem:[#allocation9 + $0x100] ss:$8 sps:$4 sm:$0xff]  }
 0x27e   :  { %v1941_v16 = vmax.f32 %v1934_v52, %v1935_v39  ;;  %v1929_v48 = vadd.f32 %v1921_v33, %v1909_v25  ;;  %v1910_v62 = vadd.f32 %v1899_v54, %v1746_v38  ;;  %v1936_v40 = vmax.f32 %v1928_v61, 0.0  ;;  %v3711_v44 = vld [vmem:[#allocation9 + $0x184] ss:$8 sps:$4 sm:$0xff]   ;;  %v3709_v12 = vld [vmem:[#allocation9 + $0x180] ss:$8 sps:$4 sm:$0xff]  }
 0x27f   :  { %v1901_v14 = vpop.f32.mrf.mxu1  ;;  %v3714_v38 = vld [vmem:[#allocation9 + $0x274] ss:$8 sps:$4 sm:$0xff]   ;;  %v3712_v61 = vld [vmem:[#allocation9 + $0x270] ss:$8 sps:$4 sm:$0xff]   ;;  %v3717_v54 = vld [vmem:[#allocation9 + $0x264] ss:$8 sps:$4 sm:$0xff]  }
 0x280   :  { %1945 = vst [vmem:[#allocation4 + $0x8] sm:$0xff] %v1941_v16  ;;  %v1937_v26 = vmax.f32 %v1929_v48, 0.0  ;;  %v1930_v63 = vadd.f32 %v1917_v53, %v1910_v62  ;;  %v1911_v27 = vadd.f32 %v1901_v14, %v1747_v13  ;;  %v3715_v16 = vld [vmem:[#allocation9 + $0x260] ss:$8 sps:$4 sm:$0xff]   ;;  %v3720_v48 = vld [vmem:[#allocation9 + $0x254] ss:$8 sps:$4 sm:$0xff]  }
 0x281   :  { %v3718_v62 = vld [vmem:[#allocation9 + $0x250] ss:$8 sps:$4 sm:$0xff]   ;;  %v3723_v13 = vld [vmem:[#allocation9 + $0x244] ss:$8 sps:$4 sm:$0xff]   ;;  %v3721_v14 = vld [vmem:[#allocation9 + $0x240] ss:$8 sps:$4 sm:$0xff]  }
 0x282   :  { %v1942_v28 = vmax.f32 %v1936_v40, %v1937_v26  ;;  %v1931_v47 = vadd.f32 %v1921_v33, %v1911_v27  ;;  %v1938_v49 = vmax.f32 %v1930_v63, 0.0  ;;  %v3672_v33 = vld [vmem:[#allocation9 + $0x164] ss:$8 sps:$4 sm:$0xff]   ;;  %v3726_v40 = vld [vmem:[#allocation9 + $0x234] ss:$8 sps:$4 sm:$0xff]  }
 0x283   :  { %v3724_v26 = vld [vmem:[#allocation9 + $0x230] ss:$8 sps:$4 sm:$0xff]   ;;  %v3729_v63 = vld [vmem:[#allocation9 + $0x224] ss:$8 sps:$4 sm:$0xff]   ;;  %v3727_v27 = vld [vmem:[#allocation9 + $0x220] ss:$8 sps:$4 sm:$0xff]  }
 0x284   :  { %1946 = vst [vmem:[#allocation4 + $0x10] sm:$0xff] %v1942_v28  ;;  %v1939_v51 = vmax.f32 %v1931_v47, 0.0  ;;  %v3732_v28 = vld [vmem:[#allocation9 + $0x214] ss:$8 sps:$4 sm:$0xff]   ;;  %v3735_v47 = vld [vmem:[#allocation9 + $0x204] ss:$8 sps:$4 sm:$0xff]  }
 0x286   :  { %v1943_v1 = vmax.f32 %v1938_v49, %v1939_v51  ;;  %v3733_v49 = vld [vmem:[#allocation9 + $0x200] ss:$8 sps:$4 sm:$0xff]  }
 0x287   :  { %v1948_v2 = vld [vmem:[#allocation4] ss:$2 sm:$0xff]  ;;  %v1952_v29 = vld [vmem:[#allocation4 + $0x1] ss:$2 sm:$0xff] }
 0x288   :  { %v1955_v15 = vmax.f32 %v1948_v2, %v1952_v29  ;;  %1947 = vst [vmem:[#allocation4 + $0x18] sm:$0xff] %v1943_v1  ;;  %v4426_v2 = vld [vmem:[#allocation3 + $0x20] sm:$0xff]  ;;  %v3736_v29 = vld [vmem:[%s4530_s7 + $0x78] sm:$0xff]  }
 0x28a   :  { %1957 = vst [vmem:[#allocation5] sm:$0xff] %v1955_v15  ;;  %v3737_v15 = vld [vmem:[%s4530_s7 + $0x38] sm:$0xff]  }
 0x28f   :  { %v1950_v30 = vld [vmem:[#allocation4 + $0x10] ss:$2 sm:$0xff]  ;;  %v1954_v19 = vld [vmem:[#allocation4 + $0x11] ss:$2 sm:$0xff] }
 0x290   :  { %v1956_v41 = vmax.f32 %v1950_v30, %v1954_v19  ;;  %v3738_v30 = vld [vmem:[%s4530_s7 + $0x70] sm:$0xff]  }
 0x291   :  { %v3739_v19 = vld [vmem:[%s4530_s7 + $0x30] sm:$0xff]  }
 0x292   :  { %1958 = vst [vmem:[#allocation5 + $0x8] sm:$0xff] %v1956_v41  ;;  %v3740_v41 = vld [vmem:[%s4530_s7 + $0x68] sm:$0xff]  }
 0x299   :  { %v1978_v31 = vld [vmem:[#allocation5 + $0x1] ss:$8 sm:$0x3]  ;;  %v1959_v53 = vld [vmem:[#allocation5] ss:$8 sm:$0x3] }
 0x29a   :  { %v1979_v55 = vpack.c.bf16 %v1978_v31, %v1978_v31  ;;  %v1960_v21 = vpack.c.bf16 %v1959_v53, %v1959_v53  ;;  %v2239_v52 = vld [vmem:[#allocation5 + $0x2] ss:$8 sm:$0x3]  ;;  %v2381_v39 = vld [vmem:[#allocation5 + $0x3] ss:$8 sm:$0x3] }
 0x29b   :  { %v2240_v25 = vpack.c.bf16 %v2239_v52, %v2239_v52  ;;  %v2382_v43 = vpack.c.bf16 %v2381_v39, %v2381_v39  ;;  %v2523_v51 = vld [vmem:[#allocation5 + $0x4] ss:$8 sm:$0x3]  ;;  %v3743_v31 = vld [vmem:[%s4530_s7 + $0x20] sm:$0xff]   ;;  %v3744_v53 = vld [vmem:[%s4530_s7 + $0x58] sm:$0xff]  }
 0x29c   :  { %2109 = vmatmul.mubr.bf16.vlgmr.msra.gmra.mxu0 %v1979_v55  ;;  %2230 = vmatmul.mubr.bf16.vlgmr.msra.gmra.mxu1 %v1960_v21  ;;  %v2524_v1 = vpack.c.bf16 %v2523_v51, %v2523_v51  ;;  %v3745_v55 = vld [vmem:[%s4530_s7 + $0x18] sm:$0xff]   ;;  %v3746_v21 = vld [vmem:[%s4530_s7 + $0x50] sm:$0xff]   ;;  %v2664_v52 = vld [vmem:[%s4529_s6] sm:$0x3] }
 0x29d   :  { %2338 = vmatpush1.bf16.msra.mxu0 %v3664_v3  ;;  %2480 = vmatpush1.bf16.msra.mxu1 %v3667_v4  ;;  %v3741_v3 = vld [vmem:[%s4530_s7 + $0x28] sm:$0xff]   ;;  %v3742_v4 = vld [vmem:[%s4530_s7 + $0x60] sm:$0xff]  }
 0x29e   :  { %2339 = vmatprep.subr.bf16.mxu0 %v3672_v33  ;;  %2481 = vmatprep.subr.bf16.mxu1 %v3675_v5  ;;  %v3747_v33 = vld [vmem:[%s4530_s7 + $0x10] sm:$0xff]   ;;  %v3748_v5 = vld [vmem:[%s4530_s7 + $0x48] sm:$0xff]  }
 0x29f   :  { %2369 = vmatprep.mubr.bf16.mxu0 %v4547_v11  ;;  %2511 = vmatprep.mubr.bf16.mxu1 %v4547_v11 }
 0x2a1   :  { %2340 = vmatpush1.bf16.msra.mxu0 %v3670_v6  ;;  %2482 = vmatpush1.bf16.msra.mxu1 %v3673_v32  ;;  %v3749_v6 = vld [vmem:[%s4530_s7 + $0x8] sm:$0xff]   ;;  %v3750_v32 = vld [vmem:[%s4530_s7 + $0x40] sm:$0xff]  }
 0x2a2   :  { %2341 = vmatprep.subr.bf16.mxu0 %v3678_v37  ;;  %2483 = vmatprep.subr.bf16.mxu1 %v3681_v56  ;;  %v3751_v37 = vld [vmem:[%s4530_s7] sm:$0xff]   ;;  %v3752_v56 = vld [vmem:[%s4532_s9 + $0x38] sm:$0xff]  }
 0x2a5   :  { %2342 = vmatpush1.bf16.msra.mxu0 %v3676_v57  ;;  %2484 = vmatpush1.bf16.msra.mxu1 %v3679_v20  ;;  %v3753_v57 = vld [vmem:[%s4532_s9 + $0x30] sm:$0xff]   ;;  %v3754_v20 = vld [vmem:[%s4532_s9 + $0x28] sm:$0xff]  }
 0x2a6   :  { %2343 = vmatprep.subr.bf16.mxu0 %v3684_v23  ;;  %2485 = vmatprep.subr.bf16.mxu1 %v3687_v58  ;;  %v3755_v23 = vld [vmem:[%s4532_s9 + $0x20] sm:$0xff]   ;;  %v3756_v58 = vld [vmem:[%s4532_s9 + $0x18] sm:$0xff]  }
 0x2a9   :  { %2344 = vmatpush1.bf16.msra.mxu0 %v3682_v7  ;;  %2486 = vmatpush1.bf16.msra.mxu1 %v3685_v50 }
 0x2aa   :  { %2345 = vmatprep.subr.bf16.mxu0 %v3690_v8  ;;  %2487 = vmatprep.subr.bf16.mxu1 %v3693_v34 }
 0x2ad   :  { %2346 = vmatpush1.bf16.msra.mxu0 %v3688_v42  ;;  %2488 = vmatpush1.bf16.msra.mxu1 %v3691_v59 }
 0x2ae   :  { %2347 = vmatprep.subr.bf16.mxu0 %v3696_v0  ;;  %2489 = vmatprep.subr.bf16.mxu1 %v3699_v22 }
 0x2b1   :  { %2348 = vmatpush1.bf16.msra.mxu0 %v3694_v17  ;;  %2490 = vmatpush1.bf16.msra.mxu1 %v3697_v9 }
 0x2b2   :  { %2349 = vmatprep.subr.bf16.mxu0 %v3702_v10  ;;  %2491 = vmatprep.subr.bf16.mxu1 %v3705_v18 }
 0x2b5   :  { %2350 = vmatpush1.bf16.msra.mxu0 %v3700_v36  ;;  %2492 = vmatpush1.bf16.msra.mxu1 %v3703_v24 }
 0x2b6   :  { %2351 = vmatprep.subr.bf16.mxu0 %v3708_v60  ;;  %2493 = vmatprep.subr.bf16.mxu1 %v3711_v44 }
 0x2b9   :  { %2352 = vmatpush1.bf16.msra.mxu0 %v3706_v45  ;;  %2494 = vmatpush1.bf16.msra.mxu1 %v3709_v12 }
 0x2ba   :  { %2621 = vmatprep.subr.bf16.mxu0 %v3714_v38  ;;  %3317 = vmatprep.subr.bf16.mxu1 %v3736_v29 }
 0x2bc   :  { %2370 = vmatmul.mubr.bf16.vlgmr.msra.gmra.mxu0 %v2240_v25  ;;  %2512 = vmatmul.mubr.bf16.vlgmr.msra.gmra.mxu1 %v2382_v43  ;;  %v2669_v25 = vrot.slane %v2664_v52, %v4343_v46  ;;  %v3757_v46 = vld [vmem:[%s4532_s9 + $0x10] sm:$0xff]  }
 0x2bd   :  { %2622 = vmatpush1.bf16.msra.mxu0 %v3712_v61  ;;  %2653 = vmatprep.mubr.bf16.mxu0 %v4547_v11  ;;  %v3730_v11 = vld [vmem:[#allocation9 + $0x210] ss:$8 sps:$4 sm:$0xff]  }
 0x2be   :  { %2623 = vmatprep.subr.bf16.mxu0 %v3717_v54  ;;  %3318 = vmatpush3.bf16.msra.mxu1 %v3737_v15 }
 0x2bf   :  { %3319 = vmatprep.subr.bf16.mxu1 %v3738_v30 }
 0x2c1   :  { %2624 = vmatpush1.bf16.msra.mxu0 %v3715_v16 }
 0x2c2   :  { %2625 = vmatprep.subr.bf16.mxu0 %v3720_v48  ;;  %3320 = vmatpush3.bf16.msra.mxu1 %v3739_v19  ;;  %v2673_v48 = vrot.slane %v2664_v52, %v4350_v35  ;;  %v3758_v35 = vld [vmem:[%s4532_s9 + $0x8] sm:$0xff]  }
 0x2c3   :  { %3321 = vmatprep.subr.bf16.mxu1 %v3740_v41 }
 0x2c5   :  { %2626 = vmatpush1.bf16.msra.mxu0 %v3718_v62 }
 0x2c6   :  { %2627 = vmatprep.subr.bf16.mxu0 %v3723_v13  ;;  %3322 = vmatpush3.bf16.msra.mxu1 %v3741_v3 }
 0x2c7   :  { %3323 = vmatprep.subr.bf16.mxu1 %v3742_v4 }
 0x2c9   :  { %2628 = vmatpush1.bf16.msra.mxu0 %v3721_v14 }
 0x2ca   :  { %2629 = vmatprep.subr.bf16.mxu0 %v3726_v40  ;;  %3324 = vmatpush3.bf16.msra.mxu1 %v3743_v31  ;;  %v3308_v31 = vld [vmem:[%s4533_s10] ss:$0 sm:$0xff] }
 0x2cb   :  { %3325 = vmatprep.subr.bf16.mxu1 %v3744_v53 }
 0x2cd   :  { %2630 = vmatpush1.bf16.msra.mxu0 %v3724_v26 }
 0x2ce   :  { %2631 = vmatprep.subr.bf16.mxu0 %v3729_v63  ;;  %3326 = vmatpush3.bf16.msra.mxu1 %v3745_v55 }
 0x2cf   :  { %3327 = vmatprep.subr.bf16.mxu1 %v3746_v21 }
 0x2d1   :  { %2632 = vmatpush1.bf16.msra.mxu0 %v3727_v27 }
 0x2d2   :  { %2633 = vmatprep.subr.bf16.mxu0 %v3732_v28  ;;  %3328 = vmatpush3.bf16.msra.mxu1 %v3747_v33 }
 0x2d3   :  { %3329 = vmatprep.subr.bf16.mxu1 %v3748_v5 }
 0x2d5   :  { %2634 = vmatpush1.bf16.msra.mxu0 %v3730_v11 }
 0x2d6   :  { %2635 = vmatprep.subr.bf16.mxu0 %v3735_v47  ;;  %3330 = vmatpush3.bf16.msra.mxu1 %v3749_v6 }
 0x2d7   :  { %3331 = vmatprep.subr.bf16.mxu1 %v3750_v32 }
 0x2d9   :  { %2636 = vmatpush1.bf16.msra.mxu0 %v3733_v49  ;;  %v3759_v49 = vld [vmem:[%s4532_s9] sm:$0xff]   ;;  %s3834_s9 = smov [#allocation11]  }
 0x2da   :  { %3348 = vmatprep.subr.bf16.mxu0 %v4426_v2  ;;  %3332 = vmatpush3.bf16.msra.mxu1 %v3751_v37  ;;  %s2977_s19 = sshll.u32 %s3834_s9, 4  ;;  %s2978_s19 = int_to_ptr.vmem [resolvable:$true] %s2977_s19 }
 0x2db   :  { %p3806_p11 = scmp.lt.s32.totalorder %s2978_s19, %s2978_s19 }
 0x2dc   :  { %2654 = vmatmul.mubr.bf16.vlgmr.msra.gmra.mxu0 %v2524_v1  ;;  %v3291_v1 = vld [vmem:[%s4531_s8] ss:$0 sm:$0xff]  ;;  %s3801_s8 = scalar_lea.vmem %s2978_s19, 32 }
 0x2dd   :  { %3349 = vmatpush3.bf16.msra.mxu0 %v3752_v56  ;;  %3364 = vmatprep.mubr.msk.bf16.mxu0 %vm3833_vm0, %v4426_v2  ;;  %p3802_p10 = scmp.ne.s32.totalorder %s2978_s19, %s3801_s8  ;;  %p3807_p12 = scmp.lt.s32.totalorder %s3801_s8, %s3801_s8 }
 0x2de   :  { %3350 = vmatprep.subr.bf16.mxu0 %v4426_v2 }
 0x2df   :  { %p3808_p13 = por %p3807_p12, %p3806_p11 }
 0x2e1   :  { %3351 = vmatpush3.bf16.msra.mxu0 %v3753_v57  ;;  %p3809_p0 = pnand %p3808_p13, %p3802_p10 }
 0x2e2   :  { %3352 = vmatprep.subr.bf16.mxu0 %v4426_v2 }
 0x2e5   :  { %3353 = vmatpush3.bf16.msra.mxu0 %v3754_v20 }
 0x2e6   :  { %3354 = vmatprep.subr.bf16.mxu0 %v4426_v2 }
 0x2e9   :  { %3355 = vmatpush3.bf16.msra.mxu0 %v3755_v23 }
 0x2ea   :  { %3356 = vmatprep.subr.bf16.mxu0 %v4426_v2 }
 0x2ed   :  { %3357 = vmatpush3.bf16.msra.mxu0 %v3756_v58 }
 0x2ee   :  { %3358 = vmatprep.subr.bf16.mxu0 %v4426_v2 }
 0x2f1   :  { %3359 = vmatpush3.bf16.msra.mxu0 %v3757_v46 }
 0x2f2   :  { %3360 = vmatprep.subr.bf16.mxu0 %v4426_v2 }
 0x2f5   :  { %3361 = vmatpush3.bf16.msra.mxu0 %v3758_v35 }
 0x2f6   :  { %3362 = vmatprep.subr.bf16.mxu0 %v4426_v2 }
 0x2f9   :  { %3363 = vmatpush3.bf16.msra.mxu0 %v3759_v49 }
 0x35c   :  { %v2110_v7 = vpop.f32.mrf.mxu0  ;;  %v2231_v50 = vpop.f32.mrf.mxu1 }
 0x35d   :  { %v2232_v45 = vadd.f32 %v2231_v50, %v2110_v7 }
 0x35e   :  { %v2112_v8 = vpop.f32.mrf.mxu0  ;;  %v2233_v34 = vpop.f32.mrf.mxu1 }
 0x35f   :  { %v2234_v12 = vadd.f32 %v2233_v34, %v2112_v8 }
 0x360   :  { %v2114_v42 = vpop.f32.mrf.mxu0  ;;  %v2235_v59 = vpop.f32.mrf.mxu1 }
 0x362   :  { %v2115_v0 = vpop.f32.mrf.mxu0  ;;  %v2236_v22 = vpop.f32.mrf.mxu1 }
 0x37c   :  { %v2371_v17 = vpop.f32.mrf.mxu0  ;;  %v2513_v9 = vpop.f32.mrf.mxu1 }
 0x37d   :  { %v2378_v38 = vadd.f32 %v2371_v17, %v2232_v45 }
 0x37e   :  { %v2373_v10 = vpop.f32.mrf.mxu0  ;;  %v2515_v18 = vpop.f32.mrf.mxu1 }
 0x37f   :  { %v2379_v39 = vadd.f32 %v2373_v10, %v2234_v12  ;;  %v2520_v61 = vadd.f32 %v2513_v9, %v2378_v38 }
 0x380   :  { %v2375_v36 = vpop.f32.mrf.mxu0  ;;  %v2517_v24 = vpop.f32.mrf.mxu1 }
 0x381   :  { %v2521_v54 = vadd.f32 %v2515_v18, %v2379_v39 }
 0x382   :  { %v2376_v60 = vpop.f32.mrf.mxu0  ;;  %v2518_v44 = vpop.f32.mrf.mxu1 }
 0x39c   :  { %v2655_v43 = vpop.f32.mrf.mxu0 }
 0x39d   :  { %v2662_v16 = vadd.f32 %v2655_v43, %v2520_v61 }
 0x39e   :  { %v2657_v62 = vpop.f32.mrf.mxu0 }
 0x39f   :  { %v2676_v13 = vadd.f32 %v2669_v25, %v2662_v16  ;;  %v2663_v14 = vadd.f32 %v2657_v62, %v2521_v54 }
 0x3a0   :  { %v2659_v40 = vpop.f32.mrf.mxu0 }
 0x3a1   :  { %v2677_v26 = vadd.f32 %v2673_v48, %v2663_v14  ;;  %v2678_v63 = vmax.f32 %v2676_v13, 0.0 }
 0x3a2   :  { %v2660_v27 = vpop.f32.mrf.mxu0 }
 0x3a3   :  { %v2679_v28 = vmax.f32 %v2677_v26, 0.0  ;;  %v2680_v47 = vpack.c.bf16 %v2678_v63, %v2678_v63 }
 0x3a5   :  { %v2681_v11 = vpack.c.bf16 %v2679_v28, %v2679_v28 }
 0x3a7   :  { %2849 = vmatprep.mubr.bf16.mxu1 %v2681_v11 }
 0x3a8   :  { %2850 = vmatmul.mubr.bf16.vlgmr.msra.gmra.mxu1 %v2680_v47 }
 0x468   :  { %v3333_v51 = vpop.f32.mrf.mxu1 }
 0x46a   :  { %v3334_v29 = vpop.f32.mrf.mxu1 }
 0x46b   :  { %v3335_v15 = vadd.f32 %v3334_v29, %v3333_v51 }
 0x46c   :  { %v3336_v30 = vpop.f32.mrf.mxu1 }
 0x46d   :  { %v2852_v19 = vadd.f32 %v3335_v15, %v3291_v1 }
 0x46e   :  { %v3337_v41 = vpop.f32.mrf.mxu1 }
 0x46f   :  { %v2857_v3 = vmax.f32 %v2852_v19, 0.0 }
 0x471   :  { %v2858_v4 = vpack.c.bf16 %v2857_v3, %v2857_v3 }
 0x473   :  { %3365 = vmatmul.mubr.bf16.vlgmr.msra.gmra.mxu0 %v2858_v4 }
 0x533   :  { %v2964_v2 = vpop.f32.mrf.mxu0 }
 0x534   :  { %v2965_v53 = vadd.f32 %v3308_v31, %v2964_v2 }
 0x535   :  { %v3366_v55 = vpop.f32.mrf.mxu0 }
 0x536   :  { %2970 = vst [vmem:[#allocation11] sm:$0x3] %v2965_v53 }
 0x537   :  { %v2967_v21 = vpop.f32.mrf.mxu0 }
 0x538   :  { %3812 = shalt.err (!%p3809_p0)
}
 0x539   :  { %2980 = dma.vmem_to_hbm [thread:$0]  %s2978_s19, 32, %s4534_s11, [#allocation8]   ;;  %v3367_v33 = vpop.f32.mrf.mxu0 }
 0x53a   :  { %3825 = dma.done.wait [#allocation8], 32  }
 0x53b   :  { %3826 = vsyncadd [#allocation8], 4294967264 }
 0x53c   :  { %2984 = vsyncpa [#allocation7], 1 }
 0x53d   :  { %2985 = vsyncpa [#allocation10], 1 }
 0x53e   :  { %2986 = vsyncpa [#allocation8], 1 }

</bundles_post_ra>
